<compile_context>
chip_gen: v5e
topology: v5e:2x2
jax: 0.10.0
libtpu: 0.0.40
codegen_flags: <defaults>
</compile_context>

<pallas_src>
import functools
import math

import jax
import jax.numpy as jnp
from jax.experimental import pallas as pl
from jax.experimental.pallas import tpu as pltpu


def _round_up(x, m):
    return (x + m - 1) // m * m


def _triplet_tile_kernel(b_actual,
                         embs_row_ref, embs_col_ref,
                         sq_row_ref, sq_col_ref,
                         pid_row_ref, pid_col_ref,
                         loss_ref, correct_ref,
                         pos_max_acc, pos_min_acc, neg_min_acc):
    i = pl.program_id(0)
    j = pl.program_id(1)
    n_j = pl.num_programs(1)

    @pl.when(j == 0)
    def _init():
        pos_max_acc[...] = jnp.full_like(pos_max_acc, -jnp.inf)
        pos_min_acc[...] = jnp.full_like(pos_min_acc, jnp.inf)
        neg_min_acc[...] = jnp.full_like(neg_min_acc, jnp.inf)

    er = embs_row_ref[...]                       # (TM, D), native dtype
    ec = embs_col_ref[...]                       # (TN, D), native dtype
    # <x_i, x_j> tile on the MXU (contract the last dims -> no transpose needed).
    gram = jax.lax.dot_general(
        er, ec, dimension_numbers=(((1,), (1,)), ((), ())),
        preferred_element_type=jnp.float32)      # (TM, TN) f32

    d2 = sq_row_ref[...] + sq_col_ref[...] - 2.0 * gram
    dists = jnp.sqrt(jnp.maximum(d2, 0.0))       # (TM, TN) f32

    tm, tn = dists.shape
    row_g = i * tm + jax.lax.broadcasted_iota(jnp.int32, (tm, tn), 0)
    col_g = j * tn + jax.lax.broadcasted_iota(jnp.int32, (tm, tn), 1)
    same_pid = pid_row_ref[...] == pid_col_ref[...]   # (TM,1)==(1,TN) -> (TM,TN)
    valid_col = col_g < b_actual                      # mask padded columns
    pos_mask = same_pid & (row_g != col_g) & valid_col
    neg_mask = jnp.logical_not(same_pid) & valid_col

    minf = jnp.float32(-jnp.inf)
    pinf = jnp.float32(jnp.inf)
    pos_max_acc[...] = jnp.maximum(
        pos_max_acc[...],
        jnp.max(jnp.where(pos_mask, dists, minf), axis=1, keepdims=True))
    pos_min_acc[...] = jnp.minimum(
        pos_min_acc[...],
        jnp.min(jnp.where(pos_mask, dists, pinf), axis=1, keepdims=True))
    neg_min_acc[...] = jnp.minimum(
        neg_min_acc[...],
        jnp.min(jnp.where(neg_mask, dists, pinf), axis=1, keepdims=True))

    @pl.when(j == n_j - 1)
    def _finalize():
        # margin == 'soft': softplus(pos_max - neg_min); -inf (no positives) -> 0.
        diff = pos_max_acc[...] - neg_min_acc[...]
        loss_ref[...] = jnp.logaddexp(jnp.float32(0.0), diff)
        # top1: nearest non-self neighbor shares the pid
        #       <=> closest positive is closer than closest negative.
        correct_ref[...] = (pos_min_acc[...] < neg_min_acc[...]).astype(jnp.float32)


def triplet_loss_hard_soft(embs, pids, *, block_rows=256, block_cols=256):
    """embs: (B, D) float (f32/bf16); pids: (B,) int. Returns (loss, top1) scalars."""
    assert block_rows % 8 == 0 and block_cols % 128 == 0
    b, d = embs.shape

    b128 = _round_up(b, 128)
    tm = min(block_rows, b128)
    tn = min(block_cols, b128)
    b_pad = _round_up(b, math.lcm(tm, tn))
    pad = b_pad - b

    embs_p = jnp.pad(embs, ((0, pad), (0, 0)))
    pids_p = jnp.pad(pids.astype(jnp.int32), ((0, pad),), constant_values=-1)

    # Precompute squared norms and the "transposed" (1, B) views wrapper-side so
    # the kernel never does a sublane<->lane transpose.
    sq = jnp.sum(embs_p.astype(jnp.float32) ** 2, axis=-1, keepdims=True)  # (Bp, 1)
    sq_row = sq
    sq_col = sq.reshape(1, b_pad)
    pid_row = pids_p.reshape(b_pad, 1)
    pid_col = pids_p.reshape(1, b_pad)

    grid = (b_pad // tm, b_pad // tn)
    kernel = functools.partial(_triplet_tile_kernel, b)

    loss_terms, correct = pl.pallas_call(
        kernel,
        out_shape=(jax.ShapeDtypeStruct((b_pad, 1), jnp.float32),
                   jax.ShapeDtypeStruct((b_pad, 1), jnp.float32)),
        grid_spec=pltpu.PrefetchScalarGridSpec(
            num_scalar_prefetch=0,
            grid=grid,
            in_specs=[
                pl.BlockSpec((tm, d), lambda i, j: (i, 0)),   # row embeddings
                pl.BlockSpec((tn, d), lambda i, j: (j, 0)),   # column embeddings
                pl.BlockSpec((tm, 1), lambda i, j: (i, 0)),   # |x_i|^2
                pl.BlockSpec((1, tn), lambda i, j: (0, j)),   # |x_j|^2
                pl.BlockSpec((tm, 1), lambda i, j: (i, 0)),   # pid_i
                pl.BlockSpec((1, tn), lambda i, j: (0, j)),   # pid_j
            ],
            out_specs=[
                pl.BlockSpec((tm, 1), lambda i, j: (i, 0)),   # per-row softplus term
                pl.BlockSpec((tm, 1), lambda i, j: (i, 0)),   # per-row top1 flag
            ],
            scratch_shapes=[
                pltpu.VMEM((tm, 1), jnp.float32),   # hardest positive (max)
                pltpu.VMEM((tm, 1), jnp.float32),   # closest positive (min)
                pltpu.VMEM((tm, 1), jnp.float32),   # hardest negative (min)
            ],
        ),
        compiler_params=pltpu.CompilerParams(
            dimension_semantics=("parallel", "arbitrary")),
    )(embs_p, embs_p, sq_row, sq_col, pid_row, pid_col)

    loss = jnp.mean(loss_terms[:b, 0])
    top1 = jnp.mean(correct[:b, 0])
    return loss, top1


def _reference(embs, pids):
    """Pure-JAX reference mirroring the PyTorch forward (soft margin, hard mode)."""
    b = embs.shape[0]
    diff = embs[:, None, :] - embs[None, :, :]
    dists = jnp.sqrt(jnp.sum(diff * diff, axis=-1))
    pids_eq = pids[:, None] == pids[None, :]
    eye = jnp.eye(b, dtype=bool)
    pos_mask = pids_eq & ~eye
    neg_mask = ~pids_eq
    pos_dist = jnp.max(jnp.where(pos_mask, dists, -jnp.inf), axis=1)
    neg_dist = jnp.min(jnp.where(neg_mask, dists, jnp.inf), axis=1)
    loss = jnp.mean(jax.nn.softplus(pos_dist - neg_dist))
    nn_idx = jnp.argmin(jnp.where(eye, jnp.inf, dists), axis=1)
    top1 = jnp.mean((pids[nn_idx] == pids).astype(jnp.float32))
    return loss, top1


if __name__ == "__main__":
    key = jax.random.PRNGKey(0)
    B, D = 250, 128                         # B deliberately not a tile multiple
    k1, k2 = jax.random.split(key)
    embs = jax.random.normal(k1, (B, D), dtype=jnp.float32)
    pids = jax.random.randint(k2, (B,), 0, 48, dtype=jnp.int32)

    # 128x128 tiles -> 2x2 grid (exercises init/accumulate/finalize + padding mask).
    loss, top1 = triplet_loss_hard_soft(embs, pids, block_rows=128, block_cols=128)
    jax.block_until_ready((loss, top1))

    ref_loss, ref_top1 = _reference(embs, pids)
    assert jnp.allclose(loss, ref_loss, atol=2e-3, rtol=1e-3), (loss, ref_loss)
    # Exact positive/negative distance ties could flip a single row between the two
    # mathematically equivalent top1 formulations; allow at most one row of slack.
    assert abs(float(top1) - float(ref_top1)) <= 1.0 / B + 1e-6, (top1, ref_top1)
    assert bool(jnp.isfinite(loss))

    print("KERNEL_OK")
</pallas_src>

<mosaic_0001>
module attributes {stable_mosaic.version = 11 : i64} {
  func.func @_triplet_tile_kernel(%arg0: i32, %arg1: i32, %arg2: memref<128x128xf32, #tpu.memory_space<vmem>>, %arg3: memref<128x128xf32, #tpu.memory_space<vmem>>, %arg4: memref<128x1xf32, #tpu.memory_space<vmem>>, %arg5: memref<1x128xf32, #tpu.memory_space<vmem>>, %arg6: memref<128x1xi32, #tpu.memory_space<vmem>>, %arg7: memref<1x128xi32, #tpu.memory_space<vmem>>, %arg8: memref<128x1xf32, #tpu.memory_space<vmem>>, %arg9: memref<128x1xf32, #tpu.memory_space<vmem>>, %arg10: memref<128x1xf32, #tpu.memory_space<vmem>>, %arg11: memref<128x1xf32, #tpu.memory_space<vmem>>, %arg12: memref<128x1xf32, #tpu.memory_space<vmem>>) attributes {dimension_semantics = [#tpu.dimension_semantics<parallel>, #tpu.dimension_semantics<arbitrary>], iteration_bounds = array<i64: 2, 2>, scalar_prefetch = 0 : i64, scratch_operands = 3 : i64, tpu.core_type = #tpu.core_type<tc>, window_params = [{transform_indices = @transform_0, window_bounds = array<i64: 128, 128>}, {transform_indices = @transform_1, window_bounds = array<i64: 128, 128>}, {transform_indices = @transform_2, window_bounds = array<i64: 128, 1>}, {transform_indices = @transform_3, window_bounds = array<i64: 1, 128>}, {transform_indices = @transform_4, window_bounds = array<i64: 128, 1>}, {transform_indices = @transform_5, window_bounds = array<i64: 1, 128>}, {transform_indices = @transform_6, window_bounds = array<i64: 128, 1>}, {transform_indices = @transform_7, window_bounds = array<i64: 128, 1>}]} {
    %c0_i32 = arith.constant 0 : i32
    %0 = arith.cmpi eq, %arg1, %c0_i32 : i32
    %1 = arith.extui %0 : i1 to i32
    %c0_i32_0 = arith.constant 0 : i32
    %2 = arith.cmpi ne, %1, %c0_i32_0 : i32
    scf.if %2 {
      %cst_35 = arith.constant 0xFF800000 : f32
      %61 = vector.broadcast %cst_35 : f32 to vector<128x1xf32>
      %c0_36 = arith.constant 0 : index
      %c0_37 = arith.constant 0 : index
      %62 = vector.load %arg10[%c0_36, %c0_37] : memref<128x1xf32, #tpu.memory_space<vmem>>, vector<128x1xf32>
      tpu.vector_store %arg10[%c0_36, %c0_37], %61 {strides = array<i32>} : memref<128x1xf32, #tpu.memory_space<vmem>>, vector<128x1xf32>,
      %cst_38 = arith.constant 0x7F800000 : f32
      %63 = vector.broadcast %cst_38 : f32 to vector<128x1xf32>
      %c0_39 = arith.constant 0 : index
      %c0_40 = arith.constant 0 : index
      %64 = vector.load %arg11[%c0_39, %c0_40] : memref<128x1xf32, #tpu.memory_space<vmem>>, vector<128x1xf32>
      tpu.vector_store %arg11[%c0_39, %c0_40], %63 {strides = array<i32>} : memref<128x1xf32, #tpu.memory_space<vmem>>, vector<128x1xf32>,
      %cst_41 = arith.constant 0x7F800000 : f32
      %65 = vector.broadcast %cst_41 : f32 to vector<128x1xf32>
      %c0_42 = arith.constant 0 : index
      %c0_43 = arith.constant 0 : index
      %66 = vector.load %arg12[%c0_42, %c0_43] : memref<128x1xf32, #tpu.memory_space<vmem>>, vector<128x1xf32>
      tpu.vector_store %arg12[%c0_42, %c0_43], %65 {strides = array<i32>} : memref<128x1xf32, #tpu.memory_space<vmem>>, vector<128x1xf32>,
    } else {
    }
    %c0 = arith.constant 0 : index
    %c0_1 = arith.constant 0 : index
    %3 = vector.load %arg2[%c0, %c0_1] : memref<128x128xf32, #tpu.memory_space<vmem>>, vector<128x128xf32>
    %c0_2 = arith.constant 0 : index
    %c0_3 = arith.constant 0 : index
    %4 = vector.load %arg3[%c0_2, %c0_3] : memref<128x128xf32, #tpu.memory_space<vmem>>, vector<128x128xf32>
    %cst = arith.constant dense<0.000000e+00> : vector<128x128xf32>
    %5 = tpu.matmul %3, %4, %cst {dimension_numbers = #tpu.dot_dimension_numbers<[1], [1], [0], [0], [0, 0, 1, 0], [], []>} : vector<128x128xf32>, vector<128x128xf32>, vector<128x128xf32> -> vector<128x128xf32>
    %c0_4 = arith.constant 0 : index
    %c0_5 = arith.constant 0 : index
    %6 = vector.load %arg4[%c0_4, %c0_5] : memref<128x1xf32, #tpu.memory_space<vmem>>, vector<128x1xf32>
    %c0_6 = arith.constant 0 : index
    %c0_7 = arith.constant 0 : index
    %7 = vector.load %arg5[%c0_6, %c0_7] : memref<1x128xf32, #tpu.memory_space<vmem>>, vector<1x128xf32>
    %8 = vector.broadcast %6 : vector<128x1xf32> to vector<128x128xf32>
    %9 = vector.broadcast %7 : vector<1x128xf32> to vector<128x128xf32>
    %10 = arith.addf %8, %9 : vector<128x128xf32>
    %cst_8 = arith.constant 2.000000e+00 : f32
    %11 = vector.broadcast %cst_8 : f32 to vector<128x128xf32>
    %12 = arith.mulf %11, %5 : vector<128x128xf32>
    %13 = arith.subf %10, %12 : vector<128x128xf32>
    %cst_9 = arith.constant 0.000000e+00 : f32
    %14 = vector.broadcast %cst_9 : f32 to vector<128x128xf32>
    %15 = arith.maximumf %13, %14 : vector<128x128xf32>
    %16 = math.sqrt %15 : vector<128x128xf32>
    %c128_i32 = arith.constant 128 : i32
    %17 = arith.muli %arg0, %c128_i32 : i32
    %18 = tpu.iota {dimensions = array<i32: 0>} : vector<128x128xi32>
    %19 = vector.broadcast %17 : i32 to vector<128x128xi32>
    %20 = arith.addi %19, %18 : vector<128x128xi32>
    %c128_i32_10 = arith.constant 128 : i32
    %21 = arith.muli %arg1, %c128_i32_10 : i32
    %22 = tpu.iota {dimensions = array<i32: 1>} : vector<128x128xi32>
    %23 = vector.broadcast %21 : i32 to vector<128x128xi32>
    %24 = arith.addi %23, %22 : vector<128x128xi32>
    %c0_11 = arith.constant 0 : index
    %c0_12 = arith.constant 0 : index
    %25 = vector.load %arg6[%c0_11, %c0_12] : memref<128x1xi32, #tpu.memory_space<vmem>>, vector<128x1xi32>
    %c0_13 = arith.constant 0 : index
    %c0_14 = arith.constant 0 : index
    %26 = vector.load %arg7[%c0_13, %c0_14] : memref<1x128xi32, #tpu.memory_space<vmem>>, vector<1x128xi32>
    %27 = vector.broadcast %25 : vector<128x1xi32> to vector<128x128xi32>
    %28 = vector.broadcast %26 : vector<1x128xi32> to vector<128x128xi32>
    %29 = arith.cmpi eq, %27, %28 : vector<128x128xi32>
    %c250_i32 = arith.constant 250 : i32
    %30 = vector.broadcast %c250_i32 : i32 to vector<128x128xi32>
    %31 = arith.cmpi slt, %24, %30 : vector<128x128xi32>
    %32 = arith.cmpi ne, %20, %24 : vector<128x128xi32>
    %33 = arith.andi %29, %32 : vector<128x128xi1>
    %34 = arith.andi %33, %31 : vector<128x128xi1>
    %cst_15 = arith.constant dense<true> : vector<128x128xi1>
    %35 = arith.xori %29, %cst_15 : vector<128x128xi1>
    %36 = arith.andi %35, %31 : vector<128x128xi1>
    %c0_16 = arith.constant 0 : index
    %c0_17 = arith.constant 0 : index
    %37 = vector.load %arg10[%c0_16, %c0_17] : memref<128x1xf32, #tpu.memory_space<vmem>>, vector<128x1xf32>
    %cst_18 = arith.constant 0xFF800000 : f32
    %38 = vector.broadcast %cst_18 : f32 to vector<128x128xf32>
    %39 = arith.select %34, %16, %38 : vector<128x128xi1>, vector<128x128xf32>
    %cst_19 = arith.constant dense<0xFF800000> : vector<128xf32>
    %40 = vector.multi_reduction <maximumf>, %39, %cst_19 [1] : vector<128x128xf32> to vector<128xf32>
    %41 = vector.shape_cast %40 : vector<128xf32> to vector<128x1xf32>
    %42 = arith.maximumf %37, %41 : vector<128x1xf32>
    %c0_20 = arith.constant 0 : index
    %c0_21 = arith.constant 0 : index
    %43 = vector.load %arg10[%c0_20, %c0_21] : memref<128x1xf32, #tpu.memory_space<vmem>>, vector<128x1xf32>
    tpu.vector_store %arg10[%c0_20, %c0_21], %42 {strides = array<i32>} : memref<128x1xf32, #tpu.memory_space<vmem>>, vector<128x1xf32>,
    %c0_22 = arith.constant 0 : index
    %c0_23 = arith.constant 0 : index
    %44 = vector.load %arg11[%c0_22, %c0_23] : memref<128x1xf32, #tpu.memory_space<vmem>>, vector<128x1xf32>
    %cst_24 = arith.constant 0x7F800000 : f32
    %45 = vector.broadcast %cst_24 : f32 to vector<128x128xf32>
    %46 = arith.select %34, %16, %45 : vector<128x128xi1>, vector<128x128xf32>
    %cst_25 = arith.constant dense<0x7F800000> : vector<128xf32>
    %47 = vector.multi_reduction <minimumf>, %46, %cst_25 [1] : vector<128x128xf32> to vector<128xf32>
    %48 = vector.shape_cast %47 : vector<128xf32> to vector<128x1xf32>
    %49 = arith.minimumf %44, %48 : vector<128x1xf32>
    %c0_26 = arith.constant 0 : index
    %c0_27 = arith.constant 0 : index
    %50 = vector.load %arg11[%c0_26, %c0_27] : memref<128x1xf32, #tpu.memory_space<vmem>>, vector<128x1xf32>
    tpu.vector_store %arg11[%c0_26, %c0_27], %49 {strides = array<i32>} : memref<128x1xf32, #tpu.memory_space<vmem>>, vector<128x1xf32>,
    %c0_28 = arith.constant 0 : index
    %c0_29 = arith.constant 0 : index
    %51 = vector.load %arg12[%c0_28, %c0_29] : memref<128x1xf32, #tpu.memory_space<vmem>>, vector<128x1xf32>
    %cst_30 = arith.constant 0x7F800000 : f32
    %52 = vector.broadcast %cst_30 : f32 to vector<128x128xf32>
    %53 = arith.select %36, %16, %52 : vector<128x128xi1>, vector<128x128xf32>
    %cst_31 = arith.constant dense<0x7F800000> : vector<128xf32>
    %54 = vector.multi_reduction <minimumf>, %53, %cst_31 [1] : vector<128x128xf32> to vector<128xf32>
    %55 = vector.shape_cast %54 : vector<128xf32> to vector<128x1xf32>
    %56 = arith.minimumf %51, %55 : vector<128x1xf32>
    %c0_32 = arith.constant 0 : index
    %c0_33 = arith.constant 0 : index
    %57 = vector.load %arg12[%c0_32, %c0_33] : memref<128x1xf32, #tpu.memory_space<vmem>>, vector<128x1xf32>
    tpu.vector_store %arg12[%c0_32, %c0_33], %56 {strides = array<i32>} : memref<128x1xf32, #tpu.memory_space<vmem>>, vector<128x1xf32>,
    %c1_i32 = arith.constant 1 : i32
    %58 = arith.cmpi eq, %arg1, %c1_i32 : i32
    %59 = arith.extui %58 : i1 to i32
    %c0_i32_34 = arith.constant 0 : i32
    %60 = arith.cmpi ne, %59, %c0_i32_34 : i32
    scf.if %60 {
      %c0_35 = arith.constant 0 : index
      %c0_36 = arith.constant 0 : index
      %61 = vector.load %arg10[%c0_35, %c0_36] : memref<128x1xf32, #tpu.memory_space<vmem>>, vector<128x1xf32>
      %c0_37 = arith.constant 0 : index
      %c0_38 = arith.constant 0 : index
      %62 = vector.load %arg12[%c0_37, %c0_38] : memref<128x1xf32, #tpu.memory_space<vmem>>, vector<128x1xf32>
      %63 = arith.subf %61, %62 : vector<128x1xf32>
      %cst_39 = arith.constant 0.000000e+00 : f32
      %64 = vector.broadcast %cst_39 : f32 to vector<128x1xf32>
      %65 = arith.maximumf %64, %63 : vector<128x1xf32>
      %66 = vector.broadcast %cst_39 : f32 to vector<128x1xf32>
      %67 = arith.subf %66, %63 : vector<128x1xf32>
      %68 = arith.cmpf one, %67, %67 : vector<128x1xf32>
      %69 = vector.broadcast %cst_39 : f32 to vector<128x1xf32>
      %70 = arith.addf %69, %63 : vector<128x1xf32>
      %71 = math.absf %67 : vector<128x1xf32>
      %cst_40 = arith.constant 0.000000e+00 : f32
      %72 = vector.broadcast %cst_40 : f32 to vector<128x1xf32>
      %73 = arith.subf %72, %71 : vector<128x1xf32>
      %74 = math.exp %73 : vector<128x1xf32>
      %75 = math.log1p %74 : vector<128x1xf32>
      %76 = arith.addf %65, %75 : vector<128x1xf32>
      %77 = arith.select %68, %70, %76 : vector<128x1xi1>, vector<128x1xf32>
      %c0_41 = arith.constant 0 : index
      %c0_42 = arith.constant 0 : index
      %78 = vector.load %arg8[%c0_41, %c0_42] : memref<128x1xf32, #tpu.memory_space<vmem>>, vector<128x1xf32>
      tpu.vector_store %arg8[%c0_41, %c0_42], %77 {strides = array<i32>} : memref<128x1xf32, #tpu.memory_space<vmem>>, vector<128x1xf32>,
      %c0_43 = arith.constant 0 : index
      %c0_44 = arith.constant 0 : index
      %79 = vector.load %arg11[%c0_43, %c0_44] : memref<128x1xf32, #tpu.memory_space<vmem>>, vector<128x1xf32>
      %c0_45 = arith.constant 0 : index
      %c0_46 = arith.constant 0 : index
      %80 = vector.load %arg12[%c0_45, %c0_46] : memref<128x1xf32, #tpu.memory_space<vmem>>, vector<128x1xf32>
      %81 = arith.cmpf olt, %79, %80 : vector<128x1xf32>
      %82 = arith.extui %81 : vector<128x1xi1> to vector<128x1xi32>
      %83 = arith.sitofp %82 : vector<128x1xi32> to vector<128x1xf32>
      %c0_47 = arith.constant 0 : index
      %c0_48 = arith.constant 0 : index
      %84 = vector.load %arg9[%c0_47, %c0_48] : memref<128x1xf32, #tpu.memory_space<vmem>>, vector<128x1xf32>
      tpu.vector_store %arg9[%c0_47, %c0_48], %83 {strides = array<i32>} : memref<128x1xf32, #tpu.memory_space<vmem>>, vector<128x1xf32>,
    } else {
    }
    return
  }
  func.func @transform_0(%arg0: i32, %arg1: i32) -> (i32, i32) {
    %c0_i32 = arith.constant 0 : i32
    %c0_i32_0 = arith.constant 0 : i32
    return %arg0, %c0_i32 : i32, i32
  }
  func.func @transform_1(%arg0: i32, %arg1: i32) -> (i32, i32) {
    %c0_i32 = arith.constant 0 : i32
    %c0_i32_0 = arith.constant 0 : i32
    return %arg1, %c0_i32 : i32, i32
  }
  func.func @transform_2(%arg0: i32, %arg1: i32) -> (i32, i32) {
    %c0_i32 = arith.constant 0 : i32
    %c0_i32_0 = arith.constant 0 : i32
    return %arg0, %c0_i32 : i32, i32
  }
  func.func @transform_3(%arg0: i32, %arg1: i32) -> (i32, i32) {
    %c0_i32 = arith.constant 0 : i32
    %c0_i32_0 = arith.constant 0 : i32
    return %c0_i32, %arg1 : i32, i32
  }
  func.func @transform_4(%arg0: i32, %arg1: i32) -> (i32, i32) {
    %c0_i32 = arith.constant 0 : i32
    %c0_i32_0 = arith.constant 0 : i32
    return %arg0, %c0_i32 : i32, i32
  }
  func.func @transform_5(%arg0: i32, %arg1: i32) -> (i32, i32) {
    %c0_i32 = arith.constant 0 : i32
    %c0_i32_0 = arith.constant 0 : i32
    return %c0_i32, %arg1 : i32, i32
  }
  func.func @transform_6(%arg0: i32, %arg1: i32) -> (i32, i32) {
    %c0_i32 = arith.constant 0 : i32
    %c0_i32_0 = arith.constant 0 : i32
    return %arg0, %c0_i32 : i32, i32
  }
  func.func @transform_7(%arg0: i32, %arg1: i32) -> (i32, i32) {
    %c0_i32 = arith.constant 0 : i32
    %c0_i32_0 = arith.constant 0 : i32
    return %arg0, %c0_i32 : i32, i32
  }
}

</mosaic_0001>

<bundles_post_ra>
// kernel: tpu_custom_call.1
= control target key start
LH: loop header
LB: loop body
LE: loop exit
PB: predicated region body
PF: predicated region fallthrough
CT: control target
= control target key end

     0   :  { %s4386_s0 = inlined_call_operand.vmem [shape: f32[256,128], index: 0, kind: input, shape index: {}]   ;;  %s4387_s1 = inlined_call_operand.vmem [shape: f32[256,128], index: 1, kind: input, shape index: {}]   ;;  %s4388_s2 = inlined_call_operand.vmem [shape: f32[256,1], index: 2, kind: input, shape index: {}]   ;;  %s4389_s3 = inlined_call_operand.vmem [shape: f32[1,256], index: 3, kind: input, shape index: {}]   ;;  %s4390_s4 = inlined_call_operand.vmem [shape: s32[256,1], index: 4, kind: input, shape index: {}]   ;;  %s4391_s5 = inlined_call_operand.hbm [shape: s32[1,256], index: 5, kind: input, shape index: {}]   ;;  %s4392_s6 = inlined_call_operand.vmem [shape: f32[256,1], index: 6, kind: output, shape index: {0}]   ;;  %s4393_s7 = inlined_call_operand.vmem [shape: f32[256,1], index: 7, kind: output, shape index: {1}]  }
   0x1   :  { %4418 = sst [smem:[#allocation20_spill]] %s4386_s0 }
   0x2   :  { %4419 = sst [smem:[#allocation21_spill]] %s4387_s1 }
   0x3   :  { %4420 = sst [smem:[#allocation22_spill]] %s4391_s5 }
   0x4   :  { %13 = vsyncpa [#allocation6], 0 }
   0x5   :  { %15 = vsyncpa [#allocation6 + $0x1], 0  ;;  %s2462_s24 = smov 0   ;;  %s2464_s25 = smov 0  }
   0x6   :  { %s2466_s26 = smov 0   ;;  %s2468_s27 = smov 0  }
   0x7   :  { %s2470_s28 = smov 0   ;;  %s2472_s29 = smov 0  }
   0x8   :  { %s2474_s30 = smov 0   ;;  %s2476_s8 = smov 0  }
   0x9 LB: > { %s2055_s9 = sadd.s32 4294967295, %s2415_s8   ;;  %s30_s10 = sadd.s32 1, %s2407_s29  ;;  %s2415_s8 = sphi %s2476_s8, %s21_s8   ;;  %s2411_s30 = sphi %s2474_s30, %s4693_s30   ;;  %s2407_s29 = sphi %s2472_s29, %s4692_s29   ;;  %s2403_s28 = sphi %s2470_s28, %s4691_s28   ;;  %s2399_s27 = sphi %s2468_s27, %s4690_s27   ;;  %s2395_s26 = sphi %s2466_s26, %s4689_s26   ;;  %s2391_s25 = sphi %s2464_s25, %s4688_s25   ;;  %s2387_s24 = sphi %s2462_s24, %s4687_s24  }
   0xa   : > { %p31_p0 = scmp.ge.s32.totalorder %s30_s10, 2  ;;  %s33_s11 = sadd.s32 1, %s2411_s30 }
   0xb   : > { %s170_s12 = sadd.s32 1, %s2395_s26  ;;  %p177_p1 = scmp.ne.s32.totalorder %s2395_s26, %s2391_s25 }
   0xc   : > { %s4695_s10 = smov (%p31_p0, %s30_s10), 0  ;;  %s4697_s11 = smov (!%p31_p0, %s33_s11), %s2411_s30 }
   0xd   : > { %4421 = sst [smem:[#allocation8_spill]] %s4695_s10  ;;  %s167_s13 = ssub.s32 %s2407_s29, %s4695_s10 }
   0xe   : > { %p178_p2 = scmp.eq.s32.totalorder %s2415_s8, 0  ;;  %p35_p3 = scmp.ge.s32.totalorder %s4697_s11, 2 }
   0xf   : > { %p168_p4 = scmp.eq.s32.totalorder %s167_s13, 0  ;;  %p183_p6 = scmp.ne.s32.totalorder %s2391_s25, %s2387_s24 }
  0x10   : > { %p2512_p5 = por %p178_p2, %p177_p1  ;;  %s4699_s11 = smov (%p35_p3, %s4697_s11), 0 }
  0x11   : > { %4423 = sst [smem:[#allocation9_spill]] %s4699_s11  ;;  %p184_p7 = scmp.eq.s32.totalorder %s2055_s9, 0 }
  0x12   : > { %s2520_s15 = scalar_select %p168_p4, %s2395_s26, %s170_s12  }
  0x13   : > { %p2148_p8 = scmp.lt.s32.totalorder %s2415_s8, 4  ;;  %s301_s16 = sand.u32 1, %s2395_s26  }
  0x14   : > { %p2524_p9 = por %p184_p7, %p183_p6  ;;  %s4425_s5 = sld [smem:[#allocation22_spill]] }
  0x15   : > { %s304_s22 = scalar_lea.vmem [#allocation5], %s301_s16  ;;  %p2145_p10 = pnand %p2148_p8, %p2512_p5 }
  0x16   : > { %s311_s23 = sshll.u32 %s304_s22, 4  ;;  %p2059_p11 = scmp.ge.s32.totalorder %s2415_s8, 1  ;;  %s312_s23 = int_to_ptr.vmem [resolvable:$true] %s311_s23 }
  0x17   : > { %p316_p12 = scmp.lt.s32.totalorder %s2415_s8, 5  ;;  %s302_s24 = scalar_lea.sflag [#allocation6], %s301_s16 }
  0x19   : > { %p317_p13 = pnand %p2059_p11, %p316_p12 }
  0x1a   : > { %s307_s20 = scalar_lea.hbm %s4425_s5, %s2407_s29 }
  0x1b   : > { %s309_s21 = sshll.u32 %s307_s20, 4  ;;  %320 = sbr.rel (%p317_p13) target bundleno = 677 (0x2a5), region = 44  ;;  %s310_s21 = int_to_ptr.hbm [resolvable:$true] %s309_s21 }
  0x1c   : > { %2147 = dma.hbm_to_vmem [thread:$0]  (!%p2145_p10), %s310_s21, 16, %s312_s23, %s302_s24  }
  0x20   : > { %s322_s9 = sand.u32 1, %s2391_s25  }
  0x21   : > { %s323_s12 = scalar_lea.sflag [#allocation6], %s322_s9  ;;  %s2537_s13 = scalar_lea.vmem [#allocation5], %s322_s9 }
  0x22   : > { %2382 = dma.done.wait (%p2524_p9), %s323_s12, 16  }
  0x23   : > { %2384 = vsyncadd (%p2524_p9), %s323_s12, 4294967280  ;;  %s2060_s14 = sshll.u32 %s2403_s28, 4  ;;  %s2062_s16 = sshll.u32 %s2399_s27, 4 }
  0x24   : > { %p385_p0 = scmp.lt.s32.totalorder %s2060_s14, 31  ;;  %p391_p1 = scmp.lt.s32.totalorder %s2062_s16, 31 }
  0x25   : > { %p402_p2 = scmp.lt.s32.totalorder %s2399_s27, 1  ;;  %s4426_s0 = sld [smem:[#allocation20_spill]] }
  0x26   : > { %s4701_s14 = smov (!%p385_p0, %s2060_s14), 31  ;;  %s4703_s16 = smov (!%p391_p1, %s2062_s16), 31 }
  0x27   : > { %s2061_s18 = sshll.u32 %s4701_s14, 3  ;;  %s2063_s22 = sshll.u32 %s4703_s16, 3 }
  0x28   : > { %s4427_s1 = sld [smem:[#allocation21_spill]]  ;;  %s2559_s5 = scalar_lea.vmem %s4388_s2, %s2061_s18 }
  0x29   : > { %s2562_s11 = scalar_select %p402_p2, %s2399_s27, 1 }
  0x2a   : > { %s2567_s19 = scalar_lea.vmem %s4390_s4, %s2061_s18  ;;  %p2072_p3 = scmp.ne.s32.totalorder %s2399_s27, 0 }
  0x2b   : > { %s2549_s21 = scalar_lea.vmem %s4426_s0, %s2061_s18  ;;  %s2572_s0 = scalar_lea.vmem %s4392_s6, %s2061_s18 }
  0x2c   : > { %s404_s23 = scalar_lea.vmem %s4389_s3, %s2562_s11  ;;  %426 = sbr.rel (%p2072_p3) target bundleno = 98 (0x62), region = 52 }
  0x2e   : > { %s2554_s24 = scalar_lea.vmem %s4427_s1, %s2063_s22  ;;  %s2581_s1 = scalar_lea.vmem %s4393_s7, %s2061_s18 }
  0x31   : > { %vm427_vm0 = vcmask 7168   ;;  %v2417_v0 = vmov -inf   ;;  %v2418_v1 = vmov inf  }
  0x32   : > { %428 = vst.msk [vmem:[#allocation2] sm:$0xff] %vm427_vm0, %v2417_v0 }
  0x33   : > { %429 = vst.msk [vmem:[#allocation2 + $0x8] sm:$0xff] %vm427_vm0, %v2417_v0 }
  0x34   : > { %430 = vst.msk [vmem:[#allocation2 + $0x10] sm:$0xff] %vm427_vm0, %v2417_v0 }
  0x35   : > { %431 = vst.msk [vmem:[#allocation2 + $0x18] sm:$0xff] %vm427_vm0, %v2417_v0 }
  0x36   : > { %432 = vst.msk [vmem:[#allocation2 + $0x20] sm:$0xff] %vm427_vm0, %v2417_v0 }
  0x37   : > { %433 = vst.msk [vmem:[#allocation2 + $0x28] sm:$0xff] %vm427_vm0, %v2417_v0 }
  0x38   : > { %434 = vst.msk [vmem:[#allocation2 + $0x30] sm:$0xff] %vm427_vm0, %v2417_v0 }
  0x39   : > { %435 = vst.msk [vmem:[#allocation2 + $0x38] sm:$0xff] %vm427_vm0, %v2417_v0 }
  0x3a   : > { %436 = vst.msk [vmem:[#allocation2 + $0x40] sm:$0xff] %vm427_vm0, %v2417_v0 }
  0x3b   : > { %437 = vst.msk [vmem:[#allocation2 + $0x48] sm:$0xff] %vm427_vm0, %v2417_v0 }
  0x3c   : > { %438 = vst.msk [vmem:[#allocation2 + $0x50] sm:$0xff] %vm427_vm0, %v2417_v0 }
  0x3d   : > { %439 = vst.msk [vmem:[#allocation2 + $0x58] sm:$0xff] %vm427_vm0, %v2417_v0 }
  0x3e   : > { %440 = vst.msk [vmem:[#allocation2 + $0x60] sm:$0xff] %vm427_vm0, %v2417_v0 }
  0x3f   : > { %441 = vst.msk [vmem:[#allocation2 + $0x68] sm:$0xff] %vm427_vm0, %v2417_v0 }
  0x40   : > { %442 = vst.msk [vmem:[#allocation2 + $0x70] sm:$0xff] %vm427_vm0, %v2417_v0 }
  0x41   : > { %443 = vst.msk [vmem:[#allocation2 + $0x78] sm:$0xff] %vm427_vm0, %v2417_v0 }
  0x42   : > { %444 = vst.msk [vmem:[#allocation3] sm:$0xff] %vm427_vm0, %v2418_v1 }
  0x43   : > { %445 = vst.msk [vmem:[#allocation3 + $0x8] sm:$0xff] %vm427_vm0, %v2418_v1 }
  0x44   : > { %446 = vst.msk [vmem:[#allocation3 + $0x10] sm:$0xff] %vm427_vm0, %v2418_v1 }
  0x45   : > { %447 = vst.msk [vmem:[#allocation3 + $0x18] sm:$0xff] %vm427_vm0, %v2418_v1 }
  0x46   : > { %448 = vst.msk [vmem:[#allocation3 + $0x20] sm:$0xff] %vm427_vm0, %v2418_v1 }
  0x47   : > { %449 = vst.msk [vmem:[#allocation3 + $0x28] sm:$0xff] %vm427_vm0, %v2418_v1 }
  0x48   : > { %450 = vst.msk [vmem:[#allocation3 + $0x30] sm:$0xff] %vm427_vm0, %v2418_v1 }
  0x49   : > { %451 = vst.msk [vmem:[#allocation3 + $0x38] sm:$0xff] %vm427_vm0, %v2418_v1 }
  0x4a   : > { %452 = vst.msk [vmem:[#allocation3 + $0x40] sm:$0xff] %vm427_vm0, %v2418_v1 }
  0x4b   : > { %453 = vst.msk [vmem:[#allocation3 + $0x48] sm:$0xff] %vm427_vm0, %v2418_v1 }
  0x4c   : > { %454 = vst.msk [vmem:[#allocation3 + $0x50] sm:$0xff] %vm427_vm0, %v2418_v1 }
  0x4d   : > { %455 = vst.msk [vmem:[#allocation3 + $0x58] sm:$0xff] %vm427_vm0, %v2418_v1 }
  0x4e   : > { %456 = vst.msk [vmem:[#allocation3 + $0x60] sm:$0xff] %vm427_vm0, %v2418_v1 }
  0x4f   : > { %457 = vst.msk [vmem:[#allocation3 + $0x68] sm:$0xff] %vm427_vm0, %v2418_v1 }
  0x50   : > { %458 = vst.msk [vmem:[#allocation3 + $0x70] sm:$0xff] %vm427_vm0, %v2418_v1 }
  0x51   : > { %459 = vst.msk [vmem:[#allocation3 + $0x78] sm:$0xff] %vm427_vm0, %v2418_v1 }
  0x52   : > { %460 = vst.msk [vmem:[#allocation4] sm:$0xff] %vm427_vm0, %v2418_v1 }
  0x53   : > { %461 = vst.msk [vmem:[#allocation4 + $0x8] sm:$0xff] %vm427_vm0, %v2418_v1 }
  0x54   : > { %462 = vst.msk [vmem:[#allocation4 + $0x10] sm:$0xff] %vm427_vm0, %v2418_v1 }
  0x55   : > { %463 = vst.msk [vmem:[#allocation4 + $0x18] sm:$0xff] %vm427_vm0, %v2418_v1 }
  0x56   : > { %464 = vst.msk [vmem:[#allocation4 + $0x20] sm:$0xff] %vm427_vm0, %v2418_v1 }
  0x57   : > { %465 = vst.msk [vmem:[#allocation4 + $0x28] sm:$0xff] %vm427_vm0, %v2418_v1 }
  0x58   : > { %466 = vst.msk [vmem:[#allocation4 + $0x30] sm:$0xff] %vm427_vm0, %v2418_v1 }
  0x59   : > { %467 = vst.msk [vmem:[#allocation4 + $0x38] sm:$0xff] %vm427_vm0, %v2418_v1 }
  0x5a   : > { %468 = vst.msk [vmem:[#allocation4 + $0x40] sm:$0xff] %vm427_vm0, %v2418_v1 }
  0x5b   : > { %469 = vst.msk [vmem:[#allocation4 + $0x48] sm:$0xff] %vm427_vm0, %v2418_v1 }
  0x5c   : > { %470 = vst.msk [vmem:[#allocation4 + $0x50] sm:$0xff] %vm427_vm0, %v2418_v1 }
  0x5d   : > { %471 = vst.msk [vmem:[#allocation4 + $0x58] sm:$0xff] %vm427_vm0, %v2418_v1 }
  0x5e   : > { %472 = vst.msk [vmem:[#allocation4 + $0x60] sm:$0xff] %vm427_vm0, %v2418_v1 }
  0x5f   : > { %473 = vst.msk [vmem:[#allocation4 + $0x68] sm:$0xff] %vm427_vm0, %v2418_v1 }
  0x60   : > { %474 = vst.msk [vmem:[#allocation4 + $0x70] sm:$0xff] %vm427_vm0, %v2418_v1 }
  0x61   : > { %475 = vst.msk [vmem:[#allocation4 + $0x78] sm:$0xff] %vm427_vm0, %v2418_v1 }
  0x62 PF: > { %v507_v2 = vld [vmem:[%s2554_s24 + $0x78] sm:$0xff]  ;;  %v2419_v3 = vmov 0   ;;  %v575_v4 = vld [vmem:[%s2559_s5 + $0x10] sm:$0xff]  ;;  %v573_v5 = vld [vmem:[%s2559_s5] sm:$0xff]  ;;  %s2074_s18 = sshll.u32 %s2399_s27, 7  ;;  %vm4399_vm6 = vmmov 1  }
  0x63   : > { %2219 = vset.pattern.permute.xlu1 %v2419_v3  ;;  %2218 = vset.pattern.permute.xlu0 %v2419_v3  ;;  %v506_v6 = vld [vmem:[%s2554_s24 + $0x70] sm:$0xff]  ;;  %v577_v7 = vld [vmem:[%s2559_s5 + $0x20] sm:$0xff]  ;;  %v505_v8 = vld [vmem:[%s2554_s24 + $0x68] sm:$0xff]  ;;  %p2075_p4 = scmp.ne.s32.totalorder %s2399_s27, 1 }
  0x64   : > { %508 = vmatpush.xpose.msra.mxu0 %v507_v2  ;;  %2094 = vmatpush.xpose.msra.mxu1 %v507_v2  ;;  %v576_v9 = vld [vmem:[%s2559_s5 + $0x18] sm:$0xff]  ;;  %v574_v10 = vld [vmem:[%s2559_s5 + $0x8] sm:$0xff]  ;;  %v504_v11 = vld [vmem:[%s2554_s24 + $0x60] sm:$0xff] }
  0x65   : > { %2095 = vmatpush.xpose.msra.mxu2 %v507_v2  ;;  %2096 = vmatpush.xpose.msra.mxu3 %v507_v2  ;;  %v578_v12 = vld [vmem:[%s2559_s5 + $0x28] sm:$0xff]  ;;  %v503_v13 = vld [vmem:[%s2554_s24 + $0x58] sm:$0xff]  ;;  %v579_v15 = vld [vmem:[%s2559_s5 + $0x30] sm:$0xff] }
  0x66   : > { %602 = vperm.xlu1 %2219, %v575_v4   ;;  %592 = vperm.xlu0 %2218, %v573_v5   ;;  %v580_v14 = vld [vmem:[%s2559_s5 + $0x38] sm:$0xff]  ;;  %v502_v16 = vld [vmem:[%s2554_s24 + $0x50] sm:$0xff]  ;;  %v581_v17 = vld [vmem:[%s2559_s5 + $0x40] sm:$0xff] }
  0x67   : > { %2220 = vset.pattern.permute.xlu2 %v2419_v3  ;;  %v501_v18 = vld [vmem:[%s2554_s24 + $0x48] sm:$0xff]  ;;  %v583_v19 = vld [vmem:[%s2559_s5 + $0x50] sm:$0xff]  ;;  %v500_v21 = vld [vmem:[%s2554_s24 + $0x40] sm:$0xff] }
  0x68   : > { %509 = vmatpush.xpose.msra.mxu0 %v506_v6  ;;  %2097 = vmatpush.xpose.msra.mxu1 %v506_v6  ;;  %v582_v20 = vld [vmem:[%s2559_s5 + $0x48] sm:$0xff]  ;;  %v584_v22 = vld [vmem:[%s2559_s5 + $0x58] sm:$0xff]  ;;  %v585_v25 = vld [vmem:[%s2559_s5 + $0x60] sm:$0xff] }
  0x69   : > { %2098 = vmatpush.xpose.msra.mxu2 %v506_v6  ;;  %2099 = vmatpush.xpose.msra.mxu3 %v506_v6  ;;  %v499_v23 = vld [vmem:[%s2554_s24 + $0x38] sm:$0xff]  ;;  %v586_v24 = vld [vmem:[%s2559_s5 + $0x68] sm:$0xff]  ;;  %v498_v26 = vld [vmem:[%s2554_s24 + $0x30] sm:$0xff] }
  0x6a   : > { %612 = vperm.xlu2 %2220, %v577_v7   ;;  %v587_v27 = vld [vmem:[%s2559_s5 + $0x70] sm:$0xff]  ;;  %v497_v28 = vld [vmem:[%s2554_s24 + $0x28] sm:$0xff]  ;;  %v969_v29 = vld [vmem:[%s2567_s19] sm:$0xff] }
  0x6b   : > { %v588_v30 = vld [vmem:[%s2559_s5 + $0x78] sm:$0xff]  ;;  %v496_v31 = vld [vmem:[%s2554_s24 + $0x20] sm:$0xff]  ;;  %v970_v32 = vld [vmem:[%s2567_s19 + $0x8] sm:$0xff] }
  0x6c   : > { %510 = vmatpush.xpose.msra.mxu0 %v505_v8  ;;  %2100 = vmatpush.xpose.msra.mxu1 %v505_v8  ;;  %v495_v33 = vld [vmem:[%s2554_s24 + $0x18] sm:$0xff]  ;;  %v971_v35 = vld [vmem:[%s2567_s19 + $0x10] sm:$0xff]  ;;  %v973_v37 = vld [vmem:[%s2567_s19 + $0x20] sm:$0xff] }
  0x6d   : > { %2101 = vmatpush.xpose.msra.mxu2 %v505_v8  ;;  %2102 = vmatpush.xpose.msra.mxu3 %v505_v8  ;;  %v972_v34 = vld [vmem:[%s2567_s19 + $0x18] sm:$0xff]  ;;  %v494_v36 = vld [vmem:[%s2554_s24 + $0x10] sm:$0xff]  ;;  %v493_v38 = vld [vmem:[%s2554_s24 + $0x8] sm:$0xff] }
  0x6e   : > { %607 = vperm.xlu1 %2219, %v576_v9   ;;  %597 = vperm.xlu0 %2218, %v574_v10   ;;  %v975_v39 = vld [vmem:[%s2567_s19 + $0x30] sm:$0xff]  ;;  %v974_v40 = vld [vmem:[%s2567_s19 + $0x28] sm:$0xff]  ;;  %v492_v41 = vld [vmem:[%s2554_s24] sm:$0xff]  ;;  %v930_v9 = vlaneseq }
  0x6f   : > { %v976_v42 = vld [vmem:[%s2567_s19 + $0x38] sm:$0xff]  ;;  %v476_v43 = vld [vmem:[%s2549_s21] sm:$0xff]  ;;  %v978_v47 = vld [vmem:[%s2567_s19 + $0x48] sm:$0xff] }
  0x70   : > { %511 = vmatpush.xpose.msra.mxu0 %v504_v11  ;;  %2103 = vmatpush.xpose.msra.mxu1 %v504_v11  ;;  %v480_v44 = vld [vmem:[%s2549_s21 + $0x20] sm:$0xff]  ;;  %v979_v49 = vld [vmem:[%s2567_s19 + $0x50] sm:$0xff]  ;;  %v477_v50 = vld [vmem:[%s2549_s21 + $0x8] sm:$0xff] }
  0x71   : > { %2104 = vmatpush.xpose.msra.mxu2 %v504_v11  ;;  %2105 = vmatpush.xpose.msra.mxu3 %v504_v11  ;;  %v484_v45 = vld [vmem:[%s2549_s21 + $0x40] sm:$0xff]  ;;  %v481_v51 = vld [vmem:[%s2549_s21 + $0x28] sm:$0xff]  ;;  %v980_v55 = vld [vmem:[%s2567_s19 + $0x58] sm:$0xff] }
  0x72   : > { %617 = vperm.xlu2 %2220, %v578_v12   ;;  %v488_v46 = vld [vmem:[%s2549_s21 + $0x60] sm:$0xff]  ;;  %v485_v52 = vld [vmem:[%s2549_s21 + $0x48] sm:$0xff]  ;;  %v478_v57 = vld [vmem:[%s2549_s21 + $0x10] sm:$0xff]  ;;  %v2718_v12 = vshrl.u32 %v930_v9, 7 }
  0x73   : > { %v977_v48 = vld [vmem:[%s2567_s19 + $0x40] sm:$0xff]  ;;  %v489_v53 = vld [vmem:[%s2549_s21 + $0x68] sm:$0xff]  ;;  %v482_v58 = vld [vmem:[%s2549_s21 + $0x30] sm:$0xff] }
  0x74   : > { %512 = vmatpush.xpose.msra.mxu0 %v503_v13  ;;  %2106 = vmatpush.xpose.msra.mxu1 %v503_v13  ;;  %v981_v54 = vld [vmem:[%s2567_s19 + $0x60] sm:$0xff]  ;;  %v982_v56 = vld [vmem:[%s2567_s19 + $0x68] sm:$0xff]  ;;  %v486_v59 = vld [vmem:[%s2549_s21 + $0x50] sm:$0xff] }
  0x75   : > { %2107 = vmatpush.xpose.msra.mxu2 %v503_v13  ;;  %2108 = vmatpush.xpose.msra.mxu3 %v503_v13  ;;  %v490_v60 = vld [vmem:[%s2549_s21 + $0x70] sm:$0xff]  ;;  %v984_v61 = vld [vmem:[%s2567_s19 + $0x78] sm:$0xff]  ;;  %v2711_v8 = vld [vmem:[%s404_s23] ss:$0 sm:$0xff]  ;;  %v966_v13 = vand.u32 127, %v930_v9 }
  0x76   : > { %627 = vperm.xlu1 %2219, %v580_v14   ;;  %622 = vperm.xlu0 %2218, %v579_v15   ;;  %v983_v62 = vld [vmem:[%s2567_s19 + $0x70] sm:$0xff]  ;;  %v479_v63 = vld [vmem:[%s2549_s21 + $0x18] sm:$0xff] }
  0x77   : > { %v483_v0 = vld [vmem:[%s2549_s21 + $0x38] sm:$0xff] }
  0x78   : > { %513 = vmatpush.xpose.msra.mxu0 %v502_v16  ;;  %2109 = vmatpush.xpose.msra.mxu1 %v502_v16  ;;  %v487_v1 = vld [vmem:[%s2549_s21 + $0x58] sm:$0xff] }
  0x79   : > { %2110 = vmatpush.xpose.msra.mxu2 %v502_v16  ;;  %2111 = vmatpush.xpose.msra.mxu3 %v502_v16  ;;  %v491_v2 = vld [vmem:[%s2549_s21 + $0x78] sm:$0xff]  ;;  %s2073_s21 = sshll.u32 %s2403_s28, 7  ;;  %v967_v16 = vstv %s2074_s18 }
  0x7a   : > { %632 = vperm.xlu2 %2220, %v581_v17  }
  0x7c   : > { %514 = vmatpush.xpose.msra.mxu0 %v501_v18  ;;  %2112 = vmatpush.xpose.msra.mxu1 %v501_v18 }
  0x7d   : > { %2113 = vmatpush.xpose.msra.mxu2 %v501_v18  ;;  %2114 = vmatpush.xpose.msra.mxu3 %v501_v18  ;;  %v2725_v18 = vstv %s2073_s21 }
  0x7e   : > { %642 = vperm.xlu1 %2219, %v583_v19   ;;  %637 = vperm.xlu0 %2218, %v582_v20   ;;  %v2727_v19 = vadd.s32 %v967_v16, %v966_v13  ;;  %v938_v20 = vadd.s32 56, %v2718_v12  ;;  %v4446_v16 = vmov 0 }
  0x80   : > { %515 = vmatpush.xpose.msra.mxu0 %v500_v21  ;;  %2115 = vmatpush.xpose.msra.mxu1 %v500_v21 }
  0x81   : > { %2116 = vmatpush.xpose.msra.mxu2 %v500_v21  ;;  %2117 = vmatpush.xpose.msra.mxu3 %v500_v21  ;;  %v934_v21 = vadd.s32 24, %v2718_v12 }
  0x82   : > { %647 = vperm.xlu2 %2220, %v584_v22  }
  0x84   : > { %516 = vmatpush.xpose.msra.mxu0 %v499_v23  ;;  %2118 = vmatpush.xpose.msra.mxu1 %v499_v23 }
  0x85   : > { %2119 = vmatpush.xpose.msra.mxu2 %v499_v23  ;;  %2120 = vmatpush.xpose.msra.mxu3 %v499_v23 }
  0x86   : > { %657 = vperm.xlu1 %2219, %v586_v24   ;;  %652 = vperm.xlu0 %2218, %v585_v25   ;;  %v955_v24 = vadd.s32 %v2725_v18, %v938_v20  ;;  %v951_v25 = vadd.s32 %v2725_v18, %v934_v21 }
  0x88   : > { %517 = vmatpush.xpose.msra.mxu0 %v498_v26  ;;  %2121 = vmatpush.xpose.msra.mxu1 %v498_v26  ;;  %vm1059_vm1 = vcmp.ne.s32.totalorder %v955_v24, %v2727_v19  ;;  %vm1055_vm2 = vcmp.ne.s32.totalorder %v951_v25, %v2727_v19  ;;  %v932_v25 = vadd.s32 8, %v2718_v12 }
  0x89   : > { %2122 = vmatpush.xpose.msra.mxu2 %v498_v26  ;;  %2123 = vmatpush.xpose.msra.mxu3 %v498_v26 }
  0x8a   : > { %662 = vperm.xlu2 %2220, %v587_v27  }
  0x8c   : > { %518 = vmatpush.xpose.msra.mxu0 %v497_v28  ;;  %2124 = vmatpush.xpose.msra.mxu1 %v497_v28 }
  0x8d   : > { %2125 = vmatpush.xpose.msra.mxu2 %v497_v28  ;;  %2126 = vmatpush.xpose.msra.mxu3 %v497_v28 }
  0x8e   : > { %987 = vperm.xlu1 %2219, %v969_v29   ;;  %667 = vperm.xlu0 %2218, %v588_v30   ;;  %v941_v30 = vadd.s32 80, %v2718_v12 }
  0x90   : > { %519 = vmatpush.xpose.msra.mxu0 %v496_v31  ;;  %2127 = vmatpush.xpose.msra.mxu1 %v496_v31 }
  0x91   : > { %2128 = vmatpush.xpose.msra.mxu2 %v496_v31  ;;  %2129 = vmatpush.xpose.msra.mxu3 %v496_v31  ;;  %v958_v31 = vadd.s32 %v2725_v18, %v941_v30 }
  0x92   : > { %990 = vperm.xlu2 %2220, %v970_v32  }
  0x93   : > { %vm1062_vm3 = vcmp.ne.s32.totalorder %v958_v31, %v2727_v19 }
  0x94   : > { %520 = vmatpush.xpose.msra.mxu0 %v495_v33  ;;  %2130 = vmatpush.xpose.msra.mxu1 %v495_v33 }
  0x95   : > { %2131 = vmatpush.xpose.msra.mxu2 %v495_v33  ;;  %2132 = vmatpush.xpose.msra.mxu3 %v495_v33 }
  0x96   : > { %996 = vperm.xlu1 %2219, %v972_v34   ;;  %993 = vperm.xlu0 %2218, %v971_v35  }
  0x98   : > { %521 = vmatpush.xpose.msra.mxu0 %v494_v36  ;;  %2133 = vmatpush.xpose.msra.mxu1 %v494_v36 }
  0x99   : > { %2134 = vmatpush.xpose.msra.mxu2 %v494_v36  ;;  %2135 = vmatpush.xpose.msra.mxu3 %v494_v36 }
  0x9a   : > { %999 = vperm.xlu2 %2220, %v973_v37  }
  0x9c   : > { %522 = vmatpush.xpose.msra.mxu0 %v493_v38  ;;  %2136 = vmatpush.xpose.msra.mxu1 %v493_v38 }
  0x9d   : > { %2137 = vmatpush.xpose.msra.mxu2 %v493_v38  ;;  %2138 = vmatpush.xpose.msra.mxu3 %v493_v38  ;;  %v2758_v38 = vld [vmem:[%s2537_s13] ss:$0 sm:$0xff] }
  0x9e   : > { %1005 = vperm.xlu1 %2219, %v975_v39   ;;  %1002 = vperm.xlu0 %2218, %v974_v40   ;;  %v4428_v40 = vmov 0 }
  0xa0   : > { %523 = vmatpush.xpose.msra.mxu0 %v492_v41  ;;  %2139 = vmatpush.xpose.msra.mxu1 %v492_v41 }
  0xa1   : > { %2140 = vmatpush.xpose.msra.mxu2 %v492_v41  ;;  %2141 = vmatpush.xpose.msra.mxu3 %v492_v41  ;;  %v4431_v41 = vmov 0 }
  0xa2   : > { %1008 = vperm.xlu2 %2220, %v976_v42  }
  0xa3   : > { %524 = vmatmul.f32.vlgmr.msra.gmra.mxu0 %v476_v43  ;;  %536 = vmatmul.f32.vlgmr.msra.gmra.mxu1 %v480_v44  ;;  %v942_v44 = vadd.s32 88, %v2718_v12 }
  0xa4   : > { %548 = vmatmul.f32.vlgmr.msra.gmra.mxu2 %v484_v45  ;;  %560 = vmatmul.f32.vlgmr.msra.gmra.mxu3 %v488_v46 }
  0xa5   : > { %v959_v46 = vadd.s32 %v2725_v18, %v942_v44 }
  0xa6   : > { %1014 = vperm.xlu1 %2219, %v978_v47   ;;  %1011 = vperm.xlu0 %2218, %v977_v48  }
  0xa7   : > { %vm1063_vm8 = vcmp.ne.s32.totalorder %v959_v46, %v2727_v19 }
  0xaa   : > { %1017 = vperm.xlu2 %2220, %v979_v49  }
  0xab   : > { %527 = vmatmul.f32.gmra.mxu0 %v477_v50  ;;  %539 = vmatmul.f32.gmra.mxu1 %v481_v51 }
  0xac   : > { %551 = vmatmul.f32.gmra.mxu2 %v485_v52  ;;  %563 = vmatmul.f32.gmra.mxu3 %v489_v53  ;;  %v946_v52 = vadd.s32 120, %v2718_v12  ;;  %v945_v53 = vadd.s32 112, %v2718_v12 }
  0xae   : > { %1023 = vperm.xlu1 %2219, %v981_v54   ;;  %1020 = vperm.xlu0 %2218, %v980_v55   ;;  %v4438_v54 = vmov 0  ;;  %v963_v55 = vadd.s32 %v2725_v18, %v946_v52 }
  0xb0   : > { %vm1067_vm15 = vcmp.ne.s32.totalorder %v963_v55, %v2727_v19  ;;  %v933_v55 = vadd.s32 16, %v2718_v12 }
  0xb2   : > { %1026 = vperm.xlu2 %2220, %v982_v56   ;;  %v962_v56 = vadd.s32 %v2725_v18, %v945_v53 }
  0xb3   : > { %530 = vmatmul.f32.gmra.mxu0 %v478_v57  ;;  %542 = vmatmul.f32.gmra.mxu1 %v482_v58  ;;  %v4441_v57 = vmov 0 }
  0xb4   : > { %554 = vmatmul.f32.gmra.mxu2 %v486_v59  ;;  %566 = vmatmul.f32.gmra.mxu3 %v490_v60  ;;  %vm1066_vm0 = vcmp.ne.s32.totalorder %v962_v56, %v2727_v19  ;;  %v4460_v56 = vmov 0 }
  0xb6   : > { %1032 = vperm.xlu1 %2219, %v984_v61   ;;  %1029 = vperm.xlu0 %2218, %v983_v62  }
  0xbb   : > { %533 = vmatmul.f32.gmra.mxu0 %v479_v63  ;;  %545 = vmatmul.f32.gmra.mxu1 %v483_v0 }
  0xbc   : > { %557 = vmatmul.f32.gmra.mxu2 %v487_v1  ;;  %569 = vmatmul.f32.gmra.mxu3 %v491_v2 }
  0xc4   : > { %v2696_v3 = vpop.permute.xlu2 %612 }
  0xc5   : > { %v677_v9 = vadd.f32 %v2711_v8, %v2696_v3  ;;  %v935_v3 = vadd.s32 32, %v2718_v12 }
  0xcc   : > { %v2698_v4 = vpop.permute.xlu2 %617 }
  0xd4   : > { %v2700_v5 = vpop.permute.xlu2 %632 }
  0xd8   : > { %v2702_v6 = vpop.permute.xlu1 %602  ;;  %v2704_v7 = vpop.permute.xlu0 %592 }
  0xdc   : > { %v648_v10 = vpop.permute.xlu2 %647 }
  0xdd   : > { %v2714_v11 = vadd.f32 %v2711_v8, %v648_v10  ;;  %v673_v10 = vadd.f32 %v2711_v8, %v2704_v7  ;;  %v681_v7 = vadd.f32 %v2711_v8, %v2700_v5  ;;  %v2861_v5 = vadd.s32 %v2725_v18, %v935_v3 }
  0xe0   : > { %v608_v14 = vpop.permute.xlu1 %607  ;;  %v2720_v15 = vpop.permute.xlu0 %597 }
  0xe1   : > { %v2723_v17 = vadd.f32 %v2711_v8, %v608_v14 }
  0xe4   : > { %v663_v22 = vpop.permute.xlu2 %662 }
  0xe5   : > { %v2732_v23 = vadd.f32 %v2711_v8, %v663_v22  ;;  %v4449_v22 = vmov 0 }
  0xe8   : > { %v628_v26 = vpop.permute.xlu1 %627  ;;  %v2738_v27 = vpop.permute.xlu0 %622 }
  0xe9   : > { %v2741_v28 = vadd.f32 %v2711_v8, %v628_v26 }
  0xec   : > { %v2743_v29 = vpop.permute.xlu2 %990 }
  0xf0   : > { %v643_v32 = vpop.permute.xlu1 %642  ;;  %v2747_v33 = vpop.permute.xlu0 %637 }
  0xf1   : > { %v2750_v34 = vadd.f32 %v2711_v8, %v643_v32 }
  0xf4   : > { %v2753_v35 = vpop.permute.xlu2 %999 }
  0xf8   : > { %v2755_v36 = vpop.permute.xlu1 %657  ;;  %v653_v37 = vpop.permute.xlu0 %652 }
  0xf9   : > { %v685_v32 = vadd.f32 %v2711_v8, %v653_v37  ;;  %v4452_v37 = vmov 0 }
  0xfc   : > { %v1009_v39 = vpop.permute.xlu2 %1008 }
  0xfd   : > { %vm1042_vm4 = vcmp.eq.s32.totalorder %v1009_v39, %v2758_v38 }
  0xfe   : > { %vm2763_vm5 = vmand %vm1042_vm4, %vm1059_vm1 }
  0xff   : > { %v4429_v40 = vsel %vm2763_vm5, 4294967295, %v4428_v40  ;;  %vm2768_vm7 = vmxor %vm1042_vm4, %vm4399_vm6 }
 0x100   : > { %4430 = vst [vmem:[#allocation10_spill] sm:$0xff] %v4429_v40  ;;  %v4432_v41 = vsel %vm2768_vm7, 4294967295, %v4431_v41  ;;  %v2772_v42 = vpop.permute.xlu1 %987  ;;  %v668_v43 = vpop.permute.xlu0 %667 }
 0x101   : > { %4433 = vst [vmem:[#allocation11_spill] sm:$0xff] %v4432_v41  ;;  %v2776_v45 = vadd.f32 %v2711_v8, %v668_v43 }
 0x104   : > { %v1018_v47 = vpop.permute.xlu2 %1017 }
 0x105   : > { %vm1045_vm9 = vcmp.eq.s32.totalorder %v1018_v47, %v2758_v38 }
 0x106   : > { %vm2783_vm10 = vmand %vm1045_vm9, %vm1062_vm3 }
 0x107   : > { %vm2788_vm11 = vmxor %vm1045_vm9, %vm4399_vm6 }
 0x108   : > { %v997_v50 = vpop.permute.xlu1 %996  ;;  %v2792_v51 = vpop.permute.xlu0 %993 }
 0x109   : > { %vm1038_vm12 = vcmp.eq.s32.totalorder %v997_v50, %v2758_v38 }
 0x10a   : > { %vm2799_vm13 = vmand %vm1038_vm12, %vm1055_vm2 }
 0x10b   : > { %v4439_v54 = vsel %vm2799_vm13, 4294967295, %v4438_v54  ;;  %vm2806_vm14 = vmxor %vm1038_vm12, %vm4399_vm6 }
 0x10c   : > { %4440 = vst [vmem:[#allocation12_spill] sm:$0xff] %v4439_v54  ;;  %v4442_v57 = vsel %vm2806_vm14, 4294967295, %v4441_v57 }
 0x10d   : > { %4443 = vst [vmem:[#allocation13_spill] sm:$0xff] %v4442_v57 }
 0x110   : > { %v2812_v58 = vpop.permute.xlu1 %1005  ;;  %v2814_v59 = vpop.permute.xlu0 %1002 }
 0x111   : > { %vm4395_vm1 = vcmp.eq.s32.totalorder %v2812_v58, %v2758_v38 }
 0x112   : > { %vm2822_vm2 = vmxor %vm4395_vm1, %vm4399_vm6 }
 0x118   : > { %v2826_v61 = vpop.permute.xlu1 %1014  ;;  %v2828_v62 = vpop.permute.xlu0 %1011 }
 0x120   : > { %v2830_v63 = vpop.permute.xlu1 %1023  ;;  %v1021_v0 = vpop.permute.xlu0 %1020 }
 0x121   : > { %vm1046_vm3 = vcmp.eq.s32.totalorder %v1021_v0, %v2758_v38  ;;  %v525_v1 = vpop.f32.mrf.mxu0  ;;  %v537_v2 = vpop.f32.mrf.mxu1  ;;  %v678_v0 = vadd.f32 %v2711_v8, %v2698_v4  ;;  %v1136_v4 = vld [vmem:[#allocation2 + $0x20] sm:$0xff] }
 0x122   : > { %v689_v13 = vmul.f32 2.0, %v525_v1  ;;  %v693_v14 = vmul.f32 2.0, %v537_v2  ;;  %vm2839_vm4 = vmand %vm1046_vm3, %vm1063_vm8  ;;  %v4455_v1 = vmov 0 }
 0x123   : > { %v4447_v16 = vsel %vm2839_vm4, 4294967295, %v4446_v16  ;;  %vm2844_vm9 = vmxor %vm1046_vm3, %vm4399_vm6  ;;  %vm4464_vm4 = vmmov 1  }
 0x124   : > { %4448 = vst [vmem:[#allocation14_spill] sm:$0xff] %v4447_v16  ;;  %v705_v20 = vsub.f32 %v673_v10, %v689_v13  ;;  %v709_v21 = vsub.f32 %v677_v9, %v693_v14  ;;  %v4450_v22 = vsel %vm2844_vm9, 4294967295, %v4449_v22  ;;  %v2878_v9 = vadd.s32 %v2725_v18, %v932_v25 }
 0x125   : > { %4451 = vst [vmem:[#allocation15_spill] sm:$0xff] %v4450_v22  ;;  %v2895_v14 = vadd.f32 %v2711_v8, %v2702_v6  ;;  %v936_v6 = vadd.s32 40, %v2718_v12  ;;  %v944_v25 = vadd.s32 104, %v2718_v12 }
 0x126   : > { %v2849_v24 = vmax.f32 %v709_v21, 0.0  ;;  %v2854_v26 = vmax.f32 %v705_v20, 0.0  ;;  %v2899_v20 = vadd.s32 %v2725_v18, %v2718_v12  ;;  %v937_v21 = vadd.s32 48, %v2718_v12 }
 0x127   : > { %v549_v30 = vpop.f32.mrf.mxu2  ;;  %v561_v31 = vpop.f32.mrf.mxu3 }
 0x128   : > { %v697_v39 = vmul.f32 2.0, %v549_v30  ;;  %v701_v43 = vmul.f32 2.0, %v561_v31  ;;  %v1033_v44 = vpop.permute.xlu1 %1032  ;;  %v1030_v46 = vpop.permute.xlu0 %1029  ;;  %2223 = vrsqrt.f32 %v2849_v24  ;;  %v940_v30 = vadd.s32 72, %v2718_v12 }
 0x129   : > { %vm1050_vm8 = vcmp.eq.s32.totalorder %v1033_v44, %v2758_v38  ;;  %vm1049_vm12 = vcmp.eq.s32.totalorder %v1030_v46, %v2758_v38  ;;  %v540_v47 = vpop.f32.mrf.mxu1  ;;  %v528_v2 = vpop.f32.mrf.mxu0  ;;  %2225 = vrsqrt.f32 %v2854_v26  ;;  %v674_v31 = vadd.f32 %v2711_v8, %v2720_v15 }
 0x12a   : > { %v713_v50 = vsub.f32 %v681_v7, %v697_v39  ;;  %v717_v52 = vsub.f32 %v685_v32, %v701_v43  ;;  %vm2865_vm3 = vmand %vm1050_vm8, %vm1067_vm15  ;;  %v694_v53 = vmul.f32 2.0, %v540_v47  ;;  %v943_v32 = vadd.s32 96, %v2718_v12 }
 0x12b   : > { %v4453_v37 = vsel %vm2865_vm3, 4294967295, %v4452_v37  ;;  %vm2872_vm1 = vmxor %vm1050_vm8, %vm4399_vm6  ;;  %v2922_v46 = vadd.f32 %v2711_v8, %v2738_v27  ;;  %v2925_v47 = vadd.s32 %v2725_v18, %v933_v55  ;;  %v2930_v15 = vadd.f32 %v2711_v8, %v2747_v33 }
 0x12c   : > { %4454 = vst [vmem:[#allocation16_spill] sm:$0xff] %v4453_v37  ;;  %v4456_v1 = vsel %vm2872_vm1, 4294967295, %v4455_v1  ;;  %v2881_v10 = vmax.f32 %v713_v50, 0.0  ;;  %v2883_v13 = vmax.f32 %v717_v52, 0.0  ;;  %vm2889_vm15 = vmand %vm1049_vm12, %vm1066_vm0  ;;  %v710_v3 = vsub.f32 %v678_v0, %v694_v53 }
 0x12d   : > { %4457 = vst [vmem:[#allocation17_spill] sm:$0xff] %v4456_v1  ;;  %vm2905_vm8 = vmxor %vm1049_vm12, %vm4399_vm6  ;;  %v939_v50 = vadd.s32 64, %v2718_v12  ;;  %v690_v52 = vmul.f32 2.0, %v528_v2  ;;  %v2933_v0 = vadd.s32 %v2725_v18, %v937_v21  ;;  %v2942_v12 = vadd.s32 %v2725_v18, %v936_v6 }
 0x12e   : > { %v4461_v56 = vsel %vm2905_vm8, 4294967295, %v4460_v56  ;;  %v2224_v7 = vpop.eup %2223  ;;  %2227 = vrsqrt.f32 %v2883_v13  ;;  %v2935_v22 = vmax.f32 %v710_v3, 0.0  ;;  %v2945_v27 = vadd.s32 %v2725_v18, %v944_v25 }
 0x12f   : > { %4462 = vst [vmem:[#allocation18_spill] sm:$0xff] %v4461_v56  ;;  %v552_v39 = vpop.f32.mrf.mxu2  ;;  %v564_v43 = vpop.f32.mrf.mxu3  ;;  %v786_v44 = vmul.f32 %v2224_v7, %v2849_v24  ;;  %2229 = vrsqrt.f32 %v2881_v10  ;;  %v2948_v33 = vadd.s32 %v2725_v18, %v940_v30  ;;  %v2953_v2 = vadd.f32 %v2711_v8, %v2755_v36 }
 0x130   : > { %v2226_v53 = vpop.eup %2225  ;;  %4463 = vst [vmem:[#allocation19_spill] sm:$0xff] %v2945_v27  ;;  %v2956_v55 = vadd.s32 %v2725_v18, %v943_v32  ;;  %v2962_v25 = vadd.s32 %v2725_v18, %v939_v50  ;;  %v706_v30 = vsub.f32 %v674_v31, %v690_v52  ;;  %2231 = vrsqrt.f32 %v2935_v22 }
 0x131   : > { %v543_v16 = vpop.f32.mrf.mxu1  ;;  %v787_v1 = vmul.f32 %v2224_v7, %v786_v44  ;;  %v738_v3 = vmul.f32 %v2226_v53, %v2854_v26  ;;  %v531_v37 = vpop.f32.mrf.mxu0  ;;  %v795_v57 = vand.u32 2147483648, %v2849_v24  ;;  %vm4465_vm1 = vcmp.eq.s32.totalorder %v2753_v35, %v2758_v38 }
 0x132   : > { %vm2979_vm12 = vmxor %vm4465_vm1, %vm4464_vm4  ;;  %v2983_v52 = vmax.f32 %v706_v30, 0.0  ;;  %vm4468_vm6 = vcmp.ne.s32.totalorder %v2861_v5, %v2727_v19  ;;  %v747_v5 = vand.u32 2147483648, %v2854_v26  ;;  %v695_v41 = vmul.f32 2.0, %v543_v16 }
 0x133   : > { %v788_v21 = vmul.f32 0.5, %v787_v1  ;;  %v739_v36 = vmul.f32 %v2226_v53, %v738_v3  ;;  %v698_v1 = vmul.f32 2.0, %v552_v39  ;;  %v2985_v3 = vmul.f32 2.0, %v531_v37  ;;  %vm4469_vm0 = vmmov %vm4465_vm1 }
 0x134   : > { %v2228_v6 = vpop.eup %2227  ;;  %vm2993_vm9 = vmand %vm4469_vm0, %vm4468_vm6  ;;  %vm4472_vm6 = vcmp.eq.f32.partialorder %v2849_v24, inf  ;;  %vm4473_vm0 = vcmp.lt.s32.totalorder %v2727_v19, 250  ;;  %2233 = vrsqrt.f32 %v2983_v52  ;;  %vm4497_vm8 = vcmp.eq.f32.partialorder %v2883_v13, 0.0 }
 0x135   : > { %v2230_v44 = vpop.eup %2229  ;;  %v789_v8 = vsub.f32 1.5, %v788_v21  ;;  %v882_v32 = vmul.f32 %v2228_v6, %v2883_v13  ;;  %v740_v31 = vmul.f32 0.5, %v739_v36  ;;  %v702_v21 = vmul.f32 2.0, %v564_v43  ;;  %vm3011_vm14 = vmand %vm2979_vm12, %vm4473_vm0 }
 0x136   : > { %v834_v54 = vmul.f32 %v2230_v44, %v2881_v10  ;;  %v3002_v35 = vpop.eup %2231  ;;  %vm4476_vm3 = vmmov %vm4473_vm0  ;;  %vm4479_vm12 = vcmp.ne.s32.totalorder %v2899_v20, %v2727_v19  ;;  %vm4480_vm0 = vcmp.eq.s32.totalorder %v2772_v42, %v2758_v38 }
 0x137   : > { %v790_v18 = vmul.f32 %v2224_v7, %v789_v8  ;;  %v883_v50 = vmul.f32 %v2228_v6, %v882_v32  ;;  %v555_v56 = vpop.f32.mrf.mxu2  ;;  %v567_v8 = vpop.f32.mrf.mxu3  ;;  %v741_v32 = vsub.f32 1.5, %v740_v31  ;;  %vm3033_vm1 = vmand %vm4480_vm0, %vm4479_vm12  ;;  %vm4484_vm12 = vcmp.eq.f32.partialorder %v2854_v26, inf }
 0x138   : > { %v835_v27 = vmul.f32 %v2230_v44, %v834_v54  ;;  %v714_v54 = vsub.f32 %v2930_v15, %v698_v1  ;;  %v699_v7 = vmul.f32 2.0, %v555_v56 }
 0x139   : > { %v546_v36 = vpop.f32.mrf.mxu1  ;;  %v791_v30 = vmul.f32 %v790_v18, %v2849_v24  ;;  %v884_v37 = vmul.f32 0.5, %v883_v50  ;;  %v742_v15 = vmul.f32 %v2226_v53, %v741_v32  ;;  %v718_v50 = vsub.f32 %v2953_v2, %v702_v21 }
 0x13a   : > { %v696_v43 = vmul.f32 2.0, %v546_v36  ;;  %v836_v31 = vmul.f32 0.5, %v835_v27  ;;  %v707_v36 = vsub.f32 %v2895_v14, %v2985_v3  ;;  %v798_v3 = vmul.f32 %v3002_v35, %v2935_v22 }
 0x13b   : > { %v793_v40 = vsel %vm4472_vm6, %v2849_v24, %v791_v30  ;;  %v885_v1 = vsub.f32 1.5, %v884_v37  ;;  %vm3022_vm6 = vmand %vm2993_vm9, %vm4476_vm3  ;;  %vm4483_vm3 = vcmp.eq.f32.partialorder %v2849_v24, 0.0  ;;  %v743_v14 = vmul.f32 %v742_v15, %v2854_v26  ;;  %v534_v24 = vpop.f32.mrf.mxu0 }
 0x13c   : > { %v3043_v16 = vsel %vm4483_vm3, %v795_v57, %v793_v40  ;;  %v837_v27 = vsub.f32 1.5, %v836_v31  ;;  %v712_v2 = vsub.f32 %v2741_v28, %v696_v43  ;;  %v703_v32 = vmul.f32 2.0, %v567_v8  ;;  %v3090_v8 = vpop.eup %2233 }
 0x13d   : > { %v886_v20 = vmul.f32 %v2228_v6, %v885_v1  ;;  %v1345_v39 = vsel %vm3011_vm14, %v3043_v16, inf  ;;  %v1249_v21 = vsel %vm3022_vm6, %v3043_v16, inf  ;;  %v745_v40 = vsel %vm4484_vm12, %v2854_v26, %v743_v14  ;;  %vm4489_vm12 = vmmov %vm4480_vm0 }
 0x13e   : > { %1365 = vmin.xlane.f32.xlu1 %v1345_v39  ;;  %1269 = vmin.xlane.f32.xlu0 %v1249_v21  ;;  %v838_v57 = vmul.f32 %v2230_v44, %v837_v27  ;;  %v711_v6 = vsub.f32 %v2922_v46, %v695_v41  ;;  %vm4485_vm14 = vcmp.eq.f32.partialorder %v2854_v26, 0.0  ;;  %vm4486_vm3 = vcmp.lt.s32.totalorder %v2727_v19, 250  ;;  %vm3077_vm13 = vmxor %vm4489_vm12, %vm4464_vm4 }
 0x13f   : > { %v887_v28 = vmul.f32 %v886_v20, %v2883_v13  ;;  %v3063_v37 = vsel %vm4485_vm14, %v747_v5, %v745_v40  ;;  %vm3069_vm9 = vmand %vm3033_vm1, %vm4486_vm3  ;;  %v3081_v56 = vmax.f32 %v714_v54, 0.0  ;;  %vm4492_vm1 = vcmp.eq.f32.partialorder %v2883_v13, inf  ;;  %v558_v18 = vpop.f32.mrf.mxu2  ;;  %v570_v1 = vpop.f32.mrf.mxu3 }
 0x140   : > { %v1148_v26 = vsel %vm3069_vm9, %v3063_v37, -inf  ;;  %v891_v44 = vand.u32 2147483648, %v2883_v13  ;;  %vm4493_vm14 = vcmp.ne.s32.totalorder %v2956_v55, %v2727_v19  ;;  %vm4494_vm3 = vcmp.eq.s32.totalorder %v2830_v63, %v2758_v38 }
 0x141   : > { %v889_v46 = vsel %vm4492_vm1, %v2883_v13, %v887_v28  ;;  %vm3098_vm12 = vmand %vm4494_vm3, %vm4493_vm14  ;;  %v3102_v54 = vmax.f32 %v718_v50, 0.0  ;;  %v692_v5 = vmul.f32 2.0, %v534_v24  ;;  %1164 = vmax.xlane.f32.xlu2 %v1148_v26  ;;  %v3106_v15 = vmax.f32 %v712_v2, 0.0 }
 0x142   : > { %v3110_v55 = vsel %vm4497_vm8, %v891_v44, %v889_v46  ;;  %v839_v31 = vmul.f32 %v838_v57, %v2881_v10  ;;  %v799_v53 = vmul.f32 %v3002_v35, %v798_v3  ;;  %v3114_v50 = vmax.f32 %v707_v36, 0.0 }
 0x143   : > { %v3116_v14 = vmax.f32 %v711_v6, 0.0  ;;  %v715_v20 = vsub.f32 %v2750_v34, %v699_v7  ;;  %v719_v27 = vsub.f32 %v2732_v23, %v703_v32  ;;  %vm4498_vm14 = vcmp.lt.s32.totalorder %v2727_v19, 250 }
 0x144   : > { %vm1116_vm3 = vmand %vm3077_vm13, %vm4498_vm14  ;;  %vm1057_vm8 = vcmp.ne.s32.totalorder %v2942_v12, %v2727_v19  ;;  %v700_v13 = vmul.f32 2.0, %v558_v18  ;;  %v800_v23 = vmul.f32 0.5, %v799_v53  ;;  %v750_v36 = vmul.f32 %v3090_v8, %v2983_v52 }
 0x145   : > { %vm4499_vm1 = vmmov %vm4498_vm14  ;;  %2235 = vrsqrt.f32 %v3081_v56  ;;  %v708_v2 = vsub.f32 %v2723_v17, %v692_v5  ;;  %v704_v39 = vmul.f32 2.0, %v570_v1  ;;  %v1341_v3 = vsel %vm1116_vm3, %v3063_v37, inf }
 0x146   : > { %vm3132_vm5 = vmand %vm3098_vm12, %vm4499_vm1  ;;  %2237 = vrsqrt.f32 %v3106_v15  ;;  %1357 = vmin.xlane.f32.xlu0 %v1341_v3  ;;  %vm4502_vm13 = vcmp.eq.f32.partialorder %v2881_v10, inf  ;;  %v801_v40 = vsub.f32 1.5, %v800_v23  ;;  %v751_v28 = vmul.f32 %v3090_v8, %v750_v36 }
 0x147   : > { %v1160_v21 = vsel %vm3132_vm5, %v3110_v55, -inf  ;;  %v841_v24 = vsel %vm4502_vm13, %v2881_v10, %v839_v31  ;;  %vm4503_vm12 = vcmp.ne.s32.totalorder %v2962_v25, %v2727_v19  ;;  %vm4504_vm1 = vcmp.eq.s32.totalorder %v2828_v62, %v2758_v38 }
 0x148   : > { %1188 = vmax.xlane.f32.xlu1 %v1160_v21  ;;  %vm3155_vm14 = vmand %vm4504_vm1, %vm4503_vm12  ;;  %v3159_v57 = vmax.f32 %v719_v27, 0.0  ;;  %v843_v6 = vand.u32 2147483648, %v2881_v10  ;;  %vm804_vm3 = vcmp.eq.f32.partialorder %v2935_v22, inf  ;;  %2239 = vrsqrt.f32 %v3102_v54 }
 0x149   : > { %v716_v7 = vsub.f32 %v2714_v11, %v700_v13  ;;  %v1152_v25 = vsel %vm3022_vm6, %v3043_v16, -inf  ;;  %v802_v32 = vmul.f32 %v3002_v35, %v801_v40  ;;  %v752_v41 = vmul.f32 0.5, %v751_v28 }
 0x14a   : > { %v3171_v26 = vmax.f32 %v715_v20, 0.0  ;;  %v3173_v46 = vmax.f32 %v708_v2, 0.0  ;;  %1172 = vmax.xlane.f32.xlu2 %v1152_v25  ;;  %vm4507_vm12 = vcmp.eq.f32.partialorder %v2881_v10, 0.0  ;;  %2241 = vrsqrt.f32 %v3114_v50 }
 0x14b   : > { %v3177_v44 = vsel %vm4507_vm12, %v843_v6, %v841_v24  ;;  %v3180_v11 = vpop.eup %2235  ;;  %v720_v30 = vsub.f32 %v2776_v45, %v704_v39  ;;  %vm4508_vm6 = vcmp.lt.s32.totalorder %v2727_v19, 250  ;;  %v803_v16 = vmul.f32 %v802_v32, %v2935_v22 }
 0x14c   : > { %vm3187_vm1 = vmand %vm3155_vm14, %vm4508_vm6  ;;  %v753_v42 = vsub.f32 1.5, %v752_v41  ;;  %2243 = vrsqrt.f32 %v3116_v14  ;;  %vm4511_vm13 = vcmp.eq.s32.totalorder %v2830_v63, %v2758_v38  ;;  %v807_v10 = vand.u32 2147483648, %v2935_v22  ;;  %v3208_v18 = vpop.eup %2237 }
 0x14d   : > { %vm3199_vm0 = vmxor %vm4511_vm13, %vm4464_vm4  ;;  %v846_v5 = vmul.f32 %v3180_v11, %v3081_v56  ;;  %2245 = vrsqrt.f32 %v3159_v57  ;;  %v3210_v1 = vmax.f32 %v716_v7, 0.0  ;;  %v1253_v63 = vsel %vm3187_vm1, %v3177_v44, inf }
 0x14e   : > { %v754_v31 = vmul.f32 %v3090_v8, %v753_v42  ;;  %vm756_vm13 = vcmp.eq.f32.partialorder %v2983_v52, inf  ;;  %v3217_v53 = vpop.eup %2239  ;;  %vm4514_vm12 = vcmp.eq.s32.totalorder %v2828_v62, %v2758_v38  ;;  %v1156_v27 = vsel %vm3187_vm1, %v3177_v44, -inf  ;;  %vm4517_vm1 = vmmov %vm4508_vm6 }
 0x14f   : > { %vm3225_vm14 = vmxor %vm4514_vm12, %vm4464_vm4  ;;  %v805_v8 = vsel %vm804_vm3, %v2935_v22, %v803_v16  ;;  %v847_v13 = vmul.f32 %v3180_v11, %v846_v5  ;;  %2247 = vrsqrt.f32 %v3171_v26  ;;  %v3238_v23 = vmax.f32 %v720_v30, 0.0  ;;  %1180 = vmax.xlane.f32.xlu0 %v1156_v27 }
 0x150   : > { %2249 = vrsqrt.f32 %v3173_v46  ;;  %1277 = vmin.xlane.f32.xlu1 %v1253_v63  ;;  %v1245_v62 = vsel %vm3069_vm9, %v3063_v37, inf  ;;  %vm3247_vm12 = vmand %vm3199_vm0, %vm4517_vm1  ;;  %v759_v2 = vand.u32 2147483648, %v2983_v52  ;;  %v3252_v39 = vpop.eup %2241  ;;  %vm4520_vm9 = vcmp.eq.s32.totalorder %v2814_v59, %v2758_v38 }
 0x151   : > { %vm3262_vm6 = vmand %vm4520_vm9, %vm1057_vm8  ;;  %v1353_v43 = vsel %vm3247_vm12, %v3110_v55, inf  ;;  %v1257_v21 = vsel %vm3132_vm5, %v3110_v55, inf  ;;  %vm758_vm0 = vcmp.eq.f32.partialorder %v2983_v52, 0.0  ;;  %v848_v3 = vmul.f32 0.5, %v847_v13 }
 0x152   : > { %v894_v12 = vmul.f32 %v3217_v53, %v3102_v54  ;;  %v3275_v24 = vpop.eup %2243  ;;  %vm4523_vm8 = vcmp.eq.f32.partialorder %v2935_v22, 0.0  ;;  %v755_v28 = vmul.f32 %v754_v31, %v2983_v52  ;;  %v762_v17 = vmul.f32 %v3252_v39, %v3114_v50  ;;  %1261 = vmin.xlane.f32.xlu2 %v1245_v62  ;;  %vm4524_vm9 = vmmov %vm4517_vm1 }
 0x153   : > { %v3279_v40 = vsel %vm4523_vm8, %v807_v10, %v805_v8  ;;  %v822_v6 = vmul.f32 %v3208_v18, %v3106_v15  ;;  %v3286_v7 = vpop.eup %2245  ;;  %2251 = vrsqrt.f32 %v3210_v1  ;;  %vm3297_vm8 = vmand %vm3225_vm14, %vm4524_vm9  ;;  %v849_v25 = vsub.f32 1.5, %v848_v3 }
 0x154   : > { %v895_v32 = vmul.f32 %v3217_v53, %v894_v12  ;;  %v810_v41 = vmul.f32 %v3275_v24, %v3116_v14  ;;  %2253 = vrsqrt.f32 %v3238_v23  ;;  %vm4527_vm12 = vmmov %vm4517_vm1  ;;  %v1349_v35 = vsel %vm3297_vm8, %v3177_v44, inf }
 0x155   : > { %vm3309_vm1 = vmand %vm3262_vm6, %vm4527_vm12  ;;  %v855_v16 = vand.u32 2147483648, %v3081_v56  ;;  %v763_v42 = vmul.f32 %v3252_v39, %v762_v17  ;;  %v2248_v45 = vpop.eup %2247  ;;  %v771_v5 = vand.u32 2147483648, %v3114_v50  ;;  %v906_v31 = vmul.f32 %v3286_v7, %v3159_v57 }
 0x156   : > { %v1250_v10 = vsel %vm3309_vm1, %v3279_v40, inf  ;;  %v811_v63 = vmul.f32 %v3275_v24, %v810_v41  ;;  %v3326_v20 = vpop.eup %2249  ;;  %vm4530_vm6 = vcmp.eq.s32.totalorder %v2743_v29, %v2758_v38  ;;  %v757_v8 = vsel %vm756_vm13, %v2983_v52, %v755_v28 }
 0x157   : > { %vm3332_vm12 = vmxor %vm4530_vm6, %vm4464_vm4  ;;  %v764_v13 = vmul.f32 0.5, %v763_v42  ;;  %v858_v62 = vmul.f32 %v2248_v45, %v3171_v26  ;;  %v823_v36 = vmul.f32 %v3208_v18, %v822_v6  ;;  %v850_v37 = vmul.f32 %v3180_v11, %v849_v25  ;;  %1381 = vmin.xlane.f32.xlu0 %v1353_v43 }
 0x158   : > { %v896_v3 = vmul.f32 0.5, %v895_v32  ;;  %v812_v12 = vmul.f32 0.5, %v811_v63  ;;  %v907_v17 = vmul.f32 %v3286_v7, %v906_v31  ;;  %vm4533_vm13 = vcmp.ne.s32.totalorder %v2878_v9, %v2727_v19  ;;  %vm4534_vm14 = vmmov %vm4530_vm6  ;;  %1271 = vmin.xlane.f32.xlu1 %v1250_v10 }
 0x159   : > { %vm3353_vm9 = vmand %vm4534_vm14, %vm4533_vm13  ;;  %v765_v6 = vsub.f32 1.5, %v764_v13  ;;  %v819_v11 = vand.u32 2147483648, %v3116_v14  ;;  %v859_v25 = vmul.f32 %v2248_v45, %v858_v62  ;;  %v824_v32 = vmul.f32 0.5, %v823_v36  ;;  %v3358_v41 = vpop.eup %2251 }
 0x15a   : > { %vm4537_vm6 = vcmp.lt.s32.totalorder %v2727_v19, 250  ;;  %v1153_v29 = vsel %vm3309_vm1, %v3279_v40, -inf  ;;  %v813_v43 = vsub.f32 1.5, %v812_v12  ;;  %v908_v42 = vmul.f32 0.5, %v907_v17  ;;  %v3373_v63 = vpop.eup %2253  ;;  %1285 = vmin.xlane.f32.xlu2 %v1257_v21 }
 0x15b   : > { %vm3364_vm3 = vmand %vm3332_vm12, %vm4537_vm6  ;;  %v915_v10 = vand.u32 2147483648, %v3159_v57  ;;  %vm4540_vm13 = vcmp.ne.s32.totalorder %v2933_v0, %v2727_v19  ;;  %vm4541_vm12 = vcmp.eq.s32.totalorder %v2812_v58, %v2758_v38  ;;  %v3389_v27 = vsel %vm758_vm0, %v759_v2, %v757_v8 }
 0x15c   : > { %vm3381_vm6 = vmand %vm4541_vm12, %vm4540_vm13  ;;  %v766_v13 = vmul.f32 %v3252_v39, %v765_v6  ;;  %v860_v62 = vmul.f32 0.5, %v859_v25  ;;  %v825_v36 = vsub.f32 1.5, %v824_v32  ;;  %vm4544_vm13 = vcmp.lt.s32.totalorder %v2727_v19, 250 }
 0x15d   : > { %vm3401_vm12 = vmand %vm3353_vm9, %vm4544_vm13  ;;  %v4545_v58 = vmov 0  ;;  %v851_v0 = vmul.f32 %v850_v37, %v3081_v56  ;;  %v897_v52 = vsub.f32 1.5, %v896_v3  ;;  %v814_v2 = vmul.f32 %v3275_v24, %v813_v43 }
 0x15e   : > { %v4546_v58 = vsel %vm3401_vm12, 4294967295, %v4545_v58  ;;  %vm4547_vm5 = vcmp.eq.s32.totalorder %v2792_v51, %v2758_v38  ;;  %v767_v34 = vmul.f32 %v766_v13, %v3114_v50  ;;  %v909_v39 = vsub.f32 1.5, %v908_v42 }
 0x15f   : > { %vm3413_vm1 = vmxor %vm4547_vm5, %vm4464_vm4  ;;  %v861_v21 = vsub.f32 1.5, %v860_v62  ;;  %vm4550_vm13 = vcmp.eq.s32.totalorder %v2814_v59, %v2758_v38  ;;  %v1342_v8 = vsel %vm3364_vm3, %v3389_v27, inf  ;;  %v1149_v37 = vsel %vm3401_vm12, %v3389_v27, -inf  ;;  %v1329_v59 = vld [vmem:[#allocation4 + $0x20] sm:$0xff] }
 0x160   : > { %vm3423_vm0 = vmxor %vm4550_vm13, %vm4464_vm4  ;;  %v815_v3 = vmul.f32 %v814_v2, %v3116_v14  ;;  %vm4553_vm5 = vcmp.lt.s32.totalorder %v2727_v19, 250  ;;  %v867_v12 = vand.u32 2147483648, %v3171_v26  ;;  %vm4556_vm13 = vcmp.ne.s32.totalorder %v2948_v33, %v2727_v19  ;;  %1359 = vmin.xlane.f32.xlu1 %v1342_v8  ;;  %1166 = vmax.xlane.f32.xlu0 %v1149_v37 }
 0x161   : > { %vm3438_vm9 = vmand %vm3381_vm6, %vm4553_vm5  ;;  %vm4557_vm3 = vcmp.eq.s32.totalorder %v2826_v61, %v2758_v38  ;;  %vm4560_vm4 = vcmp.eq.f32.partialorder %v3114_v50, inf  ;;  %v910_v6 = vmul.f32 %v3286_v7, %v909_v39  ;;  %v862_v25 = vmul.f32 %v2248_v45, %v861_v21 }
 0x162   : > { %vm3449_vm14 = vmand %vm4557_vm3, %vm4556_vm13  ;;  %v769_v28 = vsel %vm4560_vm4, %v3114_v50, %v767_v34  ;;  %v826_v32 = vmul.f32 %v3208_v18, %v825_v36  ;;  %vm4561_vm5 = vcmp.eq.f32.partialorder %v3081_v56, inf  ;;  %v898_v9 = vmul.f32 %v3217_v53, %v897_v52  ;;  %1373 = vmin.xlane.f32.xlu2 %v1349_v35 }
 0x163   : > { %v853_v33 = vsel %vm4561_vm5, %v3081_v56, %v851_v0  ;;  %vm4562_vm13 = vcmp.eq.f32.partialorder %v3114_v50, 0.0  ;;  %vm4563_vm4 = vcmp.eq.f32.partialorder %v3116_v14, inf  ;;  %vm4564_vm3 = vcmp.lt.s32.totalorder %v2727_v19, 250 }
 0x164   : > { %v3468_v43 = vsel %vm4562_vm13, %v771_v5, %v769_v28  ;;  %v817_v7 = vsel %vm4563_vm4, %v3116_v14, %v815_v3  ;;  %vm3477_vm6 = vmand %vm3413_vm1, %vm4564_vm3  ;;  %vm4567_vm5 = vcmp.eq.f32.partialorder %v3116_v14, 0.0  ;;  %vm828_vm1 = vcmp.eq.f32.partialorder %v3106_v15, inf  ;;  %v1132_v14 = vld [vmem:[#allocation2] sm:$0xff] }
 0x165   : > { %v3483_v53 = vsel %vm4567_vm5, %v819_v11, %v817_v7  ;;  %vm4568_vm13 = vmmov %vm4564_vm3  ;;  %v1343_v45 = vsel %vm3477_vm6, %v3468_v43, inf  ;;  %vm830_vm4 = vcmp.eq.f32.partialorder %v3106_v15, 0.0  ;;  %v911_v42 = vmul.f32 %v910_v6, %v3159_v57 }
 0x166   : > { %vm3489_vm12 = vmand %vm2822_vm2, %vm4568_vm13  ;;  %v1154_v60 = vsel %vm3438_vm9, %v3483_v53, -inf  ;;  %v1251_v5 = vsel %vm3438_vm9, %v3483_v53, inf  ;;  %vm4573_vm2 = vcmp.eq.f32.partialorder %v3081_v56, 0.0  ;;  %v863_v13 = vmul.f32 %v862_v25, %v3171_v26 }
 0x167   : > { %vm3502_vm5 = vmand %vm3449_vm14, %vm4564_vm3  ;;  %v1347_v11 = vsel %vm3489_vm12, %v3483_v53, inf  ;;  %v3520_v31 = vsel %vm4573_vm2, %v855_v16, %v853_v33  ;;  %v827_v36 = vmul.f32 %v826_v32, %v3106_v15  ;;  %v774_v0 = vmul.f32 %v3326_v20, %v3173_v46  ;;  %v4596_v33 = vld [vmem:[#allocation19_spill] sm:$0xff] }
 0x168   : > { %vm4574_vm14 = vmmov %vm4564_vm3  ;;  %v899_v56 = vmul.f32 %v898_v9, %v3102_v54  ;;  %vm4577_vm3 = vcmp.eq.f32.partialorder %v3159_v57, inf  ;;  %v831_v52 = vand.u32 2147483648, %v3106_v15  ;;  %v918_v44 = vmul.f32 %v3373_v63, %v3238_v23  ;;  %1174 = vmax.xlane.f32.xlu0 %v1153_v29  ;;  %v4623_v9 = vld [vmem:[#allocation13_spill] sm:$0xff] }
 0x169   : > { %vm3527_vm13 = vmand %vm2783_vm10, %vm4574_vm14  ;;  %v913_v48 = vsel %vm4577_vm3, %v3159_v57, %v911_v42  ;;  %vm4581_vm8 = vcmp.eq.f32.partialorder %v3159_v57, 0.0  ;;  %v829_v2 = vsel %vm828_vm1, %v3106_v15, %v827_v36  ;;  %v775_v57 = vmul.f32 %v3326_v20, %v774_v0  ;;  %v4602_v36 = vld [vmem:[#allocation18_spill] sm:$0xff] }
 0x16a   : > { %vm4578_vm10 = vmmov %vm4574_vm14  ;;  %v3555_v22 = vsel %vm4581_vm8, %v915_v10, %v913_v48  ;;  %vm4582_vm14 = vcmp.eq.f32.partialorder %v3171_v26, inf  ;;  %v3572_v10 = vpop.permute.xlu2 %1026  ;;  %v3586_v39 = vsel %vm830_vm4, %v831_v52, %v829_v2  ;;  %v1157_v28 = vsel %vm3502_vm5, %v3520_v31, -inf }
 0x16b   : > { %vm3546_vm2 = vmand %vm2889_vm15, %vm4578_vm10  ;;  %v865_v35 = vsel %vm4582_vm14, %v3171_v26, %v863_v13  ;;  %v776_v6 = vmul.f32 0.5, %v775_v57  ;;  %v919_v32 = vmul.f32 %v3373_v63, %v918_v44  ;;  %1182 = vmax.xlane.f32.xlu1 %v1157_v28  ;;  %v870_v42 = vmul.f32 %v3358_v41, %v3210_v1  ;;  %v1134_v28 = vld [vmem:[#allocation2 + $0x10] sm:$0xff] }
 0x16c   : > { %vm4583_vm3 = vmmov %vm4578_vm10  ;;  %v1259_v55 = vsel %vm3546_vm2, %v3555_v22, inf  ;;  %v1162_v49 = vsel %vm3546_vm2, %v3555_v22, -inf  ;;  %vm4607_vm14 = vcmp.eq.s32.totalorder %v2792_v51, %v2758_v38  ;;  %v903_v51 = vand.u32 2147483648, %v3102_v54 }
 0x16d   : > { %vm3564_vm15 = vmand %vm2788_vm11, %vm4583_vm3  ;;  %vm4586_vm11 = vcmp.eq.f32.partialorder %v3171_v26, 0.0  ;;  %v777_v24 = vsub.f32 1.5, %v776_v6  ;;  %v920_v13 = vmul.f32 0.5, %v919_v32  ;;  %v871_v48 = vmul.f32 %v3358_v41, %v870_v42 }
 0x16e   : > { %v3582_v34 = vsel %vm4586_vm11, %v867_v12, %v865_v35  ;;  %vm4587_vm1 = vmmov %vm4583_vm3  ;;  %v4592_v12 = vld [vmem:[#allocation10_spill] sm:$0xff]  ;;  %vm4653_vm2 = vcmp.eq.s32.totalorder %v3572_v10, %v2758_v38 }
 0x16f   : > { %vm3592_vm10 = vmand %vm2768_vm7, %vm4587_vm1  ;;  %v1158_v37 = vsel %vm3527_vm13, %v3582_v34, -inf  ;;  %v1351_v26 = vsel %vm3564_vm15, %v3582_v34, inf  ;;  %v1255_v15 = vsel %vm3527_vm13, %v3582_v34, inf  ;;  %vm4593_vm4 = vnez %v4592_v12  ;;  %v1140_v34 = vld [vmem:[#allocation2 + $0x40] sm:$0xff] }
 0x170   : > { %v1348_v3 = vsel %vm3592_vm10, %v3586_v39, inf  ;;  %vm4591_vm7 = vmmov %vm4587_vm1 }
 0x171   : > { %vm3612_vm8 = vmand %vm4593_vm4, %vm4591_vm7  ;;  %vm900_vm4 = vcmp.eq.f32.partialorder %v3102_v54, inf  ;;  %vm4606_vm7 = vcmp.ne.s32.totalorder %v2925_v47, %v2727_v19  ;;  %v778_v47 = vmul.f32 %v3326_v20, %v777_v24 }
 0x172   : > { %v1252_v25 = vsel %vm3612_vm8, %v3586_v39, inf  ;;  %vm4597_vm11 = vmmov %vm4587_vm1  ;;  %v1155_v7 = vsel %vm3612_vm8, %v3586_v39, -inf  ;;  %v901_v0 = vsel %vm900_vm4, %v3102_v54, %v899_v56  ;;  %v872_v56 = vmul.f32 0.5, %v871_v48 }
 0x173   : > { %vm3631_vm1 = vmand %vm3423_vm0, %vm4597_vm11  ;;  %vm4603_vm11 = vnez %v4602_v36  ;;  %vm4611_vm4 = vcmp.lt.s32.totalorder %v2727_v19, 250  ;;  %v779_v57 = vmul.f32 %v778_v47, %v3173_v46  ;;  %v4628_v36 = vld [vmem:[#allocation16_spill] sm:$0xff]  ;;  %v4633_v47 = vld [vmem:[#allocation17_spill] sm:$0xff] }
 0x174   : > { %vm4601_vm0 = vmmov %vm4583_vm3  ;;  %v1346_v29 = vsel %vm3631_vm1, %v3279_v40, inf  ;;  %v921_v40 = vsub.f32 1.5, %v920_v13  ;;  %vm4610_vm1 = vnez %v4546_v58  ;;  %v783_v58 = vand.u32 2147483648, %v3173_v46 }
 0x175   : > { %vm3649_vm3 = vmand %vm4603_vm11, %vm4601_vm0  ;;  %vm4608_vm0 = vcmp.ne.s32.totalorder %v4596_v33, %v2727_v19  ;;  %vm4609_vm11 = vcmp.eq.s32.totalorder %v3572_v10, %v2758_v38  ;;  %1367 = vmin.xlane.f32.xlu2 %v1346_v29  ;;  %v1246_v35 = vsel %vm4610_vm1, %v3389_v27, inf  ;;  %v873_v21 = vsub.f32 1.5, %v872_v56 }
 0x176   : > { %vm1070_vm8 = vmand %vm4607_vm14, %vm4606_vm7  ;;  %v1355_v52 = vsel %vm3649_vm3, %v3555_v22, inf  ;;  %vm902_vm14 = vcmp.eq.f32.partialorder %v3102_v54, 0.0  ;;  %v922_v20 = vmul.f32 %v3373_v63, %v921_v40  ;;  %v4618_v63 = vld [vmem:[#allocation12_spill] sm:$0xff]  ;;  %1263 = vmin.xlane.f32.xlu0 %v1246_v35  ;;  %vm926_vm3 = vcmp.eq.f32.partialorder %v3238_v23, 0.0  ;;  %v1141_v40 = vld [vmem:[#allocation2 + $0x48] sm:$0xff] }
 0x177   : > { %vm1081_vm10 = vmand %vm4609_vm11, %vm4608_vm0  ;;  %v3676_v44 = vsel %vm902_vm14, %v903_v51, %v901_v0  ;;  %vm780_vm14 = vcmp.eq.f32.partialorder %v3173_v46, inf  ;;  %v927_v33 = vand.u32 2147483648, %v3238_v23  ;;  %vm4629_vm13 = vnez %v4628_v36  ;;  %v1133_v36 = vld [vmem:[#allocation2 + $0x8] sm:$0xff] }
 0x178   : > { %vm3683_vm7 = vmand %vm1070_vm8, %vm4611_vm4  ;;  %v781_v12 = vsel %vm780_vm14, %v3173_v46, %v779_v57  ;;  %vm782_vm8 = vcmp.eq.f32.partialorder %v3173_v46, 0.0  ;;  %v923_v6 = vmul.f32 %v922_v20, %v3238_v23  ;;  %v874_v46 = vmul.f32 %v3358_v41, %v873_v21 }
 0x179   : > { %vm4614_vm0 = vmmov %vm4611_vm4  ;;  %v1150_v27 = vsel %vm3683_vm7, %v3468_v43, -inf  ;;  %v784_v32 = vsel %vm782_vm8, %v783_v58, %v781_v12  ;;  %v879_v35 = vand.u32 2147483648, %v3210_v1  ;;  %v4638_v58 = vld [vmem:[#allocation14_spill] sm:$0xff] }
 0x17a   : > { %vm3691_vm11 = vmand %vm1081_vm10, %vm4614_vm0  ;;  %vm4619_vm10 = vnez %v4618_v63  ;;  %1168 = vmax.xlane.f32.xlu1 %v1150_v27  ;;  %v4643_v63 = vld [vmem:[#allocation15_spill] sm:$0xff] }
 0x17b   : > { %vm4617_vm1 = vmmov %vm4614_vm0  ;;  %vm924_vm0 = vcmp.eq.f32.partialorder %v3238_v23, inf  ;;  %v1161_v48 = vsel %vm3691_vm11, %v3676_v44, -inf }
 0x17c   : > { %vm3706_vm4 = vmand %vm4619_vm10, %vm4617_vm1  ;;  %v925_v13 = vsel %vm924_vm0, %v3238_v23, %v923_v6  ;;  %v875_v23 = vmul.f32 %v874_v46, %v3210_v1  ;;  %vm876_vm0 = vcmp.eq.f32.partialorder %v3210_v1, inf  ;;  %v1254_v46 = vsel %vm3502_vm5, %v3520_v31, inf }
 0x17d   : > { %vm4622_vm14 = vmmov %vm4617_vm1  ;;  %vm4624_vm1 = vnez %v4623_v9  ;;  %v1151_v24 = vsel %vm3706_vm4, %v784_v32, -inf  ;;  %v1248_v0 = vsel %vm3706_vm4, %v784_v32, inf  ;;  %v928_v51 = vsel %vm926_vm3, %v927_v33, %v925_v13  ;;  %1190 = vmax.xlane.f32.xlu2 %v1161_v48  ;;  %v1326_v13 = vld [vmem:[#allocation4 + $0x8] sm:$0xff] }
 0x17e   : > { %vm3719_vm10 = vmand %vm4624_vm1, %vm4622_vm14  ;;  %v877_v27 = vsel %vm876_vm0, %v3210_v1, %v875_v23  ;;  %vm878_vm3 = vcmp.eq.f32.partialorder %v3210_v1, 0.0  ;;  %v1258_v33 = vsel %vm3691_vm11, %v3676_v44, inf  ;;  %vm4647_vm0 = vmmov 1  }
 0x17f   : > { %vm4627_vm8 = vmmov %vm4622_vm14  ;;  %v1344_v41 = vsel %vm3719_vm10, %v784_v32, inf  ;;  %vm4634_vm14 = vnez %v4633_v47  ;;  %vm4639_vm10 = vnez %v4638_v58  ;;  %v880_v12 = vsel %vm878_vm3, %v879_v35, %v877_v27  ;;  %1287 = vmin.xlane.f32.xlu0 %v1258_v33 }
 0x180   : > { %vm3730_vm15 = vmand %vm4629_vm13, %vm4627_vm8  ;;  %v1247_v9 = vsel %vm3683_vm7, %v3468_v43, inf  ;;  %v1233_v43 = vld [vmem:[#allocation3 + $0x20] sm:$0xff] }
 0x181   : > { %vm4632_vm13 = vmmov %vm4627_vm8  ;;  %v1163_v56 = vsel %vm3730_vm15, %v928_v51, -inf  ;;  %v1260_v57 = vsel %vm3730_vm15, %v928_v51, inf  ;;  %vm4644_vm15 = vnez %v4643_v63  ;;  %v1230_v63 = vld [vmem:[#allocation3 + $0x8] sm:$0xff] }
 0x182   : > { %vm3747_vm1 = vmand %vm4634_vm14, %vm4632_vm13  ;;  %1176 = vmax.xlane.f32.xlu1 %v1154_v60  ;;  %v1144_v60 = vld [vmem:[#allocation2 + $0x60] sm:$0xff] }
 0x183   : > { %v1356_v20 = vsel %vm3747_vm1, %v928_v51, inf  ;;  %vm4637_vm4 = vmmov %vm4627_vm8  ;;  %vm4648_vm1 = vcmp.eq.s32.totalorder %v2826_v61, %v2758_v38 }
 0x184   : > { %vm3764_vm8 = vmand %vm4639_vm10, %vm4637_vm4 }
 0x185   : > { %vm4642_vm13 = vmmov %vm4637_vm4  ;;  %v1256_v1 = vsel %vm3764_vm8, %v880_v12, inf  ;;  %v1159_v6 = vsel %vm3764_vm8, %v880_v12, -inf  ;;  %1279 = vmin.xlane.f32.xlu2 %v1254_v46 }
 0x186   : > { %vm3772_vm14 = vmand %vm4644_vm15, %vm4642_vm13  ;;  %vm1212_vm13 = vcmask 7168  }
 0x187   : > { %v1352_v32 = vsel %vm3772_vm14, %v880_v12, inf  ;;  %vm1109_vm3 = vmxor %vm4648_vm1, %vm4647_vm0 }
 0x188   : > { %vm1125_vm10 = vmand %vm1109_vm3, %vm4637_vm4 }
 0x189   : > { %v1350_v54 = vsel %vm1125_vm10, %v3520_v31, inf  ;;  %vm1113_vm7 = vmxor %vm4653_vm2, %vm4647_vm0 }
 0x18a   : > { %1375 = vmin.xlane.f32.xlu0 %v1350_v54  ;;  %1265 = vmin.xlane.f32.xlu1 %v1247_v9  ;;  %vm4654_vm11 = vmmov %vm4637_vm4 }
 0x18b   : > { %vm1129_vm8 = vmand %vm1113_vm7, %vm4654_vm11 }
 0x18c   : > { %v1354_v61 = vsel %vm1129_vm8, %v3676_v44, inf }
 0x18d   : > { %1273 = vmin.xlane.f32.xlu2 %v1251_v5  ;;  %v1325_v5 = vld [vmem:[#allocation4] sm:$0xff] }
 0x192   : > { %1369 = vmin.xlane.f32.xlu0 %v1347_v11  ;;  %1289 = vmin.xlane.f32.xlu1 %v1259_v55 }
 0x195   : > { %1361 = vmin.xlane.f32.xlu2 %v1343_v45 }
 0x19a   : > { %1192 = vmax.xlane.f32.xlu0 %v1162_v49  ;;  %1377 = vmin.xlane.f32.xlu1 %v1351_v26  ;;  %v1237_v49 = vld [vmem:[#allocation3 + $0x40] sm:$0xff] }
 0x19d   : > { %1184 = vmax.xlane.f32.xlu2 %v1158_v37 }
 0x1a2   : > { %1281 = vmin.xlane.f32.xlu0 %v1255_v15  ;;  %1371 = vmin.xlane.f32.xlu1 %v1348_v3  ;;  %v1229_v15 = vld [vmem:[#allocation3] sm:$0xff] }
 0x1a5   : > { %1170 = vmax.xlane.f32.xlu2 %v1151_v24 }
 0x1aa   : > { %1275 = vmin.xlane.f32.xlu0 %v1252_v25  ;;  %1194 = vmax.xlane.f32.xlu1 %v1163_v56  ;;  %v1234_v25 = vld [vmem:[#allocation3 + $0x28] sm:$0xff] }
 0x1ab   : > { %v1137_v56 = vld [vmem:[#allocation2 + $0x28] sm:$0xff] }
 0x1ad   : > { %1178 = vmax.xlane.f32.xlu2 %v1155_v7  ;;  %v1337_v7 = vld [vmem:[#allocation4 + $0x60] sm:$0xff] }
 0x1b1   : > { %v1366_v18 = vpop.xlane.xlu1 %1365  ;;  %v1270_v53 = vpop.xlane.xlu0 %1269 }
 0x1b2   : > { %1283 = vmin.xlane.f32.xlu1 %v1256_v1  ;;  %1363 = vmin.xlane.f32.xlu0 %v1344_v41  ;;  %v1393_v50 = vmin.f32 %v1329_v59, %v1366_v18  ;;  %v1297_v45 = vmin.f32 %v1233_v43, %v1270_v53  ;;  %v1138_v59 = vld [vmem:[#allocation2 + $0x30] sm:$0xff]  ;;  %v1238_v53 = vld [vmem:[#allocation3 + $0x48] sm:$0xff] }
 0x1b4   : > { %1409 = vst.msk [vmem:[#allocation4 + $0x20] sm:$0xff] %vm1212_vm13, %v1393_v50  ;;  %v1165_v38 = vpop.xlane.xlu2 %1164 }
 0x1b5   : > { %1267 = vmin.xlane.f32.xlu2 %v1248_v0  ;;  %1313 = vst.msk [vmem:[#allocation3 + $0x20] sm:$0xff] %vm1212_vm13, %v1297_v45  ;;  %v1196_v19 = vmax.f32 %v1132_v14, %v1165_v38  ;;  %v1333_v0 = vld [vmem:[#allocation4 + $0x40] sm:$0xff] }
 0x1b7   : > { %1213 = vst.msk [vmem:[#allocation2] sm:$0xff] %vm1212_vm13, %v1196_v19  ;;  %v1334_v19 = vld [vmem:[#allocation4 + $0x48] sm:$0xff] }
 0x1b9   : > { %v1358_v31 = vpop.xlane.xlu0 %1357 }
 0x1ba   : > { %1383 = vmin.xlane.f32.xlu1 %v1354_v61  ;;  %1186 = vmax.xlane.f32.xlu0 %v1159_v6  ;;  %v1389_v16 = vmin.f32 %v1325_v5, %v1358_v31  ;;  %v1242_v61 = vld [vmem:[#allocation3 + $0x68] sm:$0xff]  ;;  %v1235_v31 = vld [vmem:[#allocation3 + $0x30] sm:$0xff] }
 0x1bb   : > { %v1189_v11 = vpop.xlane.xlu1 %1188 }
 0x1bc   : > { %v1208_v62 = vmax.f32 %v1144_v60, %v1189_v11  ;;  %1405 = vst.msk [vmem:[#allocation4] sm:$0xff] %vm1212_vm13, %v1389_v16  ;;  %v1231_v60 = vld [vmem:[#allocation3 + $0x10] sm:$0xff] }
 0x1bd   : > { %1291 = vmin.xlane.f32.xlu2 %v1260_v57  ;;  %v1173_v10 = vpop.xlane.xlu2 %1172 }
 0x1be   : > { %1225 = vst.msk [vmem:[#allocation2 + $0x60] sm:$0xff] %vm1212_vm13, %v1208_v62  ;;  %v1200_v55 = vmax.f32 %v1136_v4, %v1173_v10 }
 0x1c0   : > { %1217 = vst.msk [vmem:[#allocation2 + $0x20] sm:$0xff] %vm1212_vm13, %v1200_v55  ;;  %v1331_v55 = vld [vmem:[#allocation4 + $0x30] sm:$0xff] }
 0x1c2   : > { %1387 = vmin.xlane.f32.xlu0 %v1356_v20  ;;  %v1181_v8 = vpop.xlane.xlu0 %1180  ;;  %v1330_v20 = vld [vmem:[#allocation4 + $0x28] sm:$0xff] }
 0x1c3   : > { %v1278_v39 = vpop.xlane.xlu1 %1277  ;;  %v1204_v26 = vmax.f32 %v1140_v34, %v1181_v8 }
 0x1c4   : > { %v1301_v37 = vmin.f32 %v1237_v49, %v1278_v39  ;;  %v1243_v49 = vld [vmem:[#allocation3 + $0x70] sm:$0xff] }
 0x1c5   : > { %1379 = vmin.xlane.f32.xlu2 %v1352_v32  ;;  %v1262_v3 = vpop.xlane.xlu2 %1261  ;;  %1221 = vst.msk [vmem:[#allocation2 + $0x40] sm:$0xff] %vm1212_vm13, %v1204_v26  ;;  %v1145_v32 = vld [vmem:[#allocation2 + $0x68] sm:$0xff] }
 0x1c6   : > { %1317 = vst.msk [vmem:[#allocation3 + $0x40] sm:$0xff] %vm1212_vm13, %v1301_v37  ;;  %v1293_v17 = vmin.f32 %v1229_v15, %v1262_v3  ;;  %v1327_v37 = vld [vmem:[#allocation4 + $0x10] sm:$0xff] }
 0x1c8   : > { %1309 = vst.msk [vmem:[#allocation3] sm:$0xff] %vm1212_vm13, %v1293_v17  ;;  %v1146_v17 = vld [vmem:[#allocation2 + $0x70] sm:$0xff] }
 0x1ca   : > { %v1382_v30 = vpop.xlane.xlu0 %1381 }
 0x1cb   : > { %v1272_v44 = vpop.xlane.xlu1 %1271  ;;  %v1401_v22 = vmin.f32 %v1337_v7, %v1382_v30 }
 0x1cc   : > { %v1298_v2 = vmin.f32 %v1234_v25, %v1272_v44  ;;  %v1335_v25 = vld [vmem:[#allocation4 + $0x50] sm:$0xff] }
 0x1cd   : > { %1385 = vmin.xlane.f32.xlu2 %v1355_v52  ;;  %v1241_v52 = vld [vmem:[#allocation3 + $0x60] sm:$0xff]  ;;  %v1286_v42 = vpop.xlane.xlu2 %1285  ;;  %1417 = vst.msk [vmem:[#allocation4 + $0x60] sm:$0xff] %vm1212_vm13, %v1401_v22 }
 0x1ce   : > { %1314 = vst.msk [vmem:[#allocation3 + $0x28] sm:$0xff] %vm1212_vm13, %v1298_v2  ;;  %v1305_v24 = vmin.f32 %v1241_v52, %v1286_v42  ;;  %v1142_v2 = vld [vmem:[#allocation2 + $0x50] sm:$0xff] }
 0x1d0   : > { %1321 = vst.msk [vmem:[#allocation3 + $0x60] sm:$0xff] %vm1212_vm13, %v1305_v24  ;;  %v1239_v24 = vld [vmem:[#allocation3 + $0x50] sm:$0xff] }
 0x1d3   : > { %v1360_v29 = vpop.xlane.xlu1 %1359  ;;  %v1167_v41 = vpop.xlane.xlu0 %1166 }
 0x1d4   : > { %v1390_v48 = vmin.f32 %v1326_v13, %v1360_v29  ;;  %v1197_v51 = vmax.f32 %v1133_v36, %v1167_v41  ;;  %v1332_v13 = vld [vmem:[#allocation4 + $0x38] sm:$0xff] }
 0x1d5   : > { %v1374_v23 = vpop.xlane.xlu2 %1373 }
 0x1d6   : > { %1406 = vst.msk [vmem:[#allocation4 + $0x8] sm:$0xff] %vm1212_vm13, %v1390_v48  ;;  %v1397_v47 = vmin.f32 %v1333_v0, %v1374_v23  ;;  %v1135_v48 = vld [vmem:[#allocation2 + $0x18] sm:$0xff] }
 0x1d7   : > { %1214 = vst.msk [vmem:[#allocation2 + $0x8] sm:$0xff] %vm1212_vm13, %v1197_v51 }
 0x1d8   : > { %1413 = vst.msk [vmem:[#allocation4 + $0x40] sm:$0xff] %vm1212_vm13, %v1397_v47  ;;  %v1236_v47 = vld [vmem:[#allocation3 + $0x38] sm:$0xff] }
 0x1db   : > { %v1175_v57 = vpop.xlane.xlu0 %1174 }
 0x1dc   : > { %v1201_v58 = vmax.f32 %v1137_v56, %v1175_v57 }
 0x1de   : > { %v1183_v35 = vpop.xlane.xlu1 %1182  ;;  %1218 = vst.msk [vmem:[#allocation2 + $0x28] sm:$0xff] %vm1212_vm13, %v1201_v58 }
 0x1df   : > { %v1205_v27 = vmax.f32 %v1141_v40, %v1183_v35  ;;  %v1147_v40 = vld [vmem:[#allocation2 + $0x78] sm:$0xff] }
 0x1e1   : > { %1222 = vst.msk [vmem:[#allocation2 + $0x48] sm:$0xff] %vm1212_vm13, %v1205_v27  ;;  %v1139_v27 = vld [vmem:[#allocation2 + $0x38] sm:$0xff] }
 0x1e8   : > { %v1368_v21 = vpop.xlane.xlu2 %1367 }
 0x1e9   : > { %v1394_v12 = vmin.f32 %v1330_v20, %v1368_v21  ;;  %v1264_v1 = vpop.xlane.xlu0 %1263 }
 0x1ea   : > { %v1294_v33 = vmin.f32 %v1230_v63, %v1264_v1  ;;  %v1328_v63 = vld [vmem:[#allocation4 + $0x18] sm:$0xff] }
 0x1eb   : > { %1410 = vst.msk [vmem:[#allocation4 + $0x28] sm:$0xff] %vm1212_vm13, %v1394_v12  ;;  %v1240_v12 = vld [vmem:[#allocation3 + $0x58] sm:$0xff] }
 0x1ec   : > { %1310 = vst.msk [vmem:[#allocation3 + $0x8] sm:$0xff] %vm1212_vm13, %v1294_v33  ;;  %v1232_v33 = vld [vmem:[#allocation3 + $0x18] sm:$0xff] }
 0x1ed   : > { %v1169_v6 = vpop.xlane.xlu1 %1168 }
 0x1ee   : > { %v1198_v46 = vmax.f32 %v1134_v28, %v1169_v6 }
 0x1f0   : > { %v1191_v54 = vpop.xlane.xlu2 %1190  ;;  %1215 = vst.msk [vmem:[#allocation2 + $0x10] sm:$0xff] %vm1212_vm13, %v1198_v46 }
 0x1f1   : > { %v1209_v9 = vmax.f32 %v1145_v32, %v1191_v54 }
 0x1f2   : > { %v1288_v43 = vpop.xlane.xlu0 %1287 }
 0x1f3   : > { %1226 = vst.msk [vmem:[#allocation2 + $0x68] sm:$0xff] %vm1212_vm13, %v1209_v9  ;;  %v1306_v50 = vmin.f32 %v1242_v61, %v1288_v43  ;;  %v1338_v9 = vld [vmem:[#allocation4 + $0x68] sm:$0xff]  ;;  %v1143_v61 = vld [vmem:[#allocation2 + $0x58] sm:$0xff] }
 0x1f5   : > { %v1177_v18 = vpop.xlane.xlu1 %1176  ;;  %1322 = vst.msk [vmem:[#allocation3 + $0x68] sm:$0xff] %vm1212_vm13, %v1306_v50  ;;  %v1244_v50 = vld [vmem:[#allocation3 + $0x78] sm:$0xff] }
 0x1f6   : > { %v1202_v45 = vmax.f32 %v1138_v59, %v1177_v18 }
 0x1f8   : > { %v1280_v14 = vpop.xlane.xlu2 %1279  ;;  %1219 = vst.msk [vmem:[#allocation2 + $0x30] sm:$0xff] %vm1212_vm13, %v1202_v45 }
 0x1f9   : > { %v1302_v38 = vmin.f32 %v1238_v53, %v1280_v14 }
 0x1fb   : > { %1318 = vst.msk [vmem:[#allocation3 + $0x48] sm:$0xff] %vm1212_vm13, %v1302_v38  ;;  %v1340_v38 = vld [vmem:[#allocation4 + $0x78] sm:$0xff] }
 0x1fd   : > { %v1376_v5 = vpop.xlane.xlu0 %1375  ;;  %v1266_v11 = vpop.xlane.xlu1 %1265 }
 0x1fe   : > { %v1398_v62 = vmin.f32 %v1334_v19, %v1376_v5  ;;  %v1295_v16 = vmin.f32 %v1231_v60, %v1266_v11  ;;  %v1336_v5 = vld [vmem:[#allocation4 + $0x58] sm:$0xff] }
 0x200   : > { %v1274_v4 = vpop.xlane.xlu2 %1273  ;;  %1414 = vst.msk [vmem:[#allocation4 + $0x48] sm:$0xff] %vm1212_vm13, %v1398_v62  ;;  %v1339_v62 = vld [vmem:[#allocation4 + $0x70] sm:$0xff] }
 0x201   : > { %v1299_v10 = vmin.f32 %v1235_v31, %v1274_v4  ;;  %1311 = vst.msk [vmem:[#allocation3 + $0x10] sm:$0xff] %vm1212_vm13, %v1295_v16 }
 0x203   : > { %1315 = vst.msk [vmem:[#allocation3 + $0x30] sm:$0xff] %vm1212_vm13, %v1299_v10 }
 0x205   : > { %v1370_v34 = vpop.xlane.xlu0 %1369  ;;  %v1290_v39 = vpop.xlane.xlu1 %1289 }
 0x206   : > { %v1395_v8 = vmin.f32 %v1331_v55, %v1370_v34  ;;  %v1307_v26 = vmin.f32 %v1243_v49, %v1290_v39 }
 0x208   : > { %1411 = vst.msk [vmem:[#allocation4 + $0x30] sm:$0xff] %vm1212_vm13, %v1395_v8  ;;  %v1362_v15 = vpop.xlane.xlu2 %1361 }
 0x209   : > { %v1391_v3 = vmin.f32 %v1327_v37, %v1362_v15  ;;  %1323 = vst.msk [vmem:[#allocation3 + $0x70] sm:$0xff] %vm1212_vm13, %v1307_v26 }
 0x20b   : > { %1407 = vst.msk [vmem:[#allocation4 + $0x10] sm:$0xff] %vm1212_vm13, %v1391_v3 }
 0x20d   : > { %v1193_v7 = vpop.xlane.xlu0 %1192  ;;  %v1378_v44 = vpop.xlane.xlu1 %1377 }
 0x20e   : > { %v1210_v30 = vmax.f32 %v1146_v17, %v1193_v7  ;;  %v1399_v22 = vmin.f32 %v1335_v25, %v1378_v44 }
 0x210   : > { %1227 = vst.msk [vmem:[#allocation2 + $0x70] sm:$0xff] %vm1212_vm13, %v1210_v30  ;;  %v1185_v52 = vpop.xlane.xlu2 %1184 }
 0x211   : > { %v1206_v42 = vmax.f32 %v1142_v2, %v1185_v52  ;;  %1415 = vst.msk [vmem:[#allocation4 + $0x50] sm:$0xff] %vm1212_vm13, %v1399_v22 }
 0x213   : > { %1223 = vst.msk [vmem:[#allocation2 + $0x50] sm:$0xff] %vm1212_vm13, %v1206_v42 }
 0x215   : > { %v1282_v36 = vpop.xlane.xlu0 %1281  ;;  %v1372_v29 = vpop.xlane.xlu1 %1371 }
 0x216   : > { %v1303_v41 = vmin.f32 %v1239_v24, %v1282_v36  ;;  %v1396_v0 = vmin.f32 %v1332_v13, %v1372_v29 }
 0x218   : > { %1319 = vst.msk [vmem:[#allocation3 + $0x50] sm:$0xff] %vm1212_vm13, %v1303_v41  ;;  %v1171_v51 = vpop.xlane.xlu2 %1170 }
 0x219   : > { %1412 = vst.msk [vmem:[#allocation4 + $0x38] sm:$0xff] %vm1212_vm13, %v1396_v0  ;;  %v1199_v23 = vmax.f32 %v1135_v48, %v1171_v51 }
 0x21b   : > { %1216 = vst.msk [vmem:[#allocation2 + $0x18] sm:$0xff] %vm1212_vm13, %v1199_v23 }
 0x21d   : > { %v1276_v56 = vpop.xlane.xlu0 %1275  ;;  %v1195_v35 = vpop.xlane.xlu1 %1194 }
 0x21e   : > { %v1300_v57 = vmin.f32 %v1236_v47, %v1276_v56  ;;  %v1211_v20 = vmax.f32 %v1147_v40, %v1195_v35 }
 0x220   : > { %1316 = vst.msk [vmem:[#allocation3 + $0x38] sm:$0xff] %vm1212_vm13, %v1300_v57  ;;  %v1179_v58 = vpop.xlane.xlu2 %1178 }
 0x221   : > { %1228 = vst.msk [vmem:[#allocation2 + $0x78] sm:$0xff] %vm1212_vm13, %v1211_v20  ;;  %v1203_v21 = vmax.f32 %v1139_v27, %v1179_v58 }
 0x223   : > { %1220 = vst.msk [vmem:[#allocation2 + $0x38] sm:$0xff] %vm1212_vm13, %v1203_v21 }
 0x225   : > { %v1284_v28 = vpop.xlane.xlu1 %1283  ;;  %v1364_v1 = vpop.xlane.xlu0 %1363 }
 0x226   : > { %v1304_v6 = vmin.f32 %v1240_v12, %v1284_v28  ;;  %v1392_v32 = vmin.f32 %v1328_v63, %v1364_v1 }
 0x228   : > { %1320 = vst.msk [vmem:[#allocation3 + $0x58] sm:$0xff] %vm1212_vm13, %v1304_v6  ;;  %v1268_v46 = vpop.xlane.xlu2 %1267 }
 0x229   : > { %1408 = vst.msk [vmem:[#allocation4 + $0x18] sm:$0xff] %vm1212_vm13, %v1392_v32  ;;  %v1296_v54 = vmin.f32 %v1232_v33, %v1268_v46 }
 0x22b   : > { %1312 = vst.msk [vmem:[#allocation3 + $0x18] sm:$0xff] %vm1212_vm13, %v1296_v54 }
 0x22d   : > { %v1384_v59 = vpop.xlane.xlu1 %1383  ;;  %v1187_v43 = vpop.xlane.xlu0 %1186 }
 0x22e   : > { %v1402_v18 = vmin.f32 %v1338_v9, %v1384_v59  ;;  %v1207_v53 = vmax.f32 %v1143_v61, %v1187_v43 }
 0x230   : > { %1418 = vst.msk [vmem:[#allocation4 + $0x68] sm:$0xff] %vm1212_vm13, %v1402_v18  ;;  %v1292_v45 = vpop.xlane.xlu2 %1291 }
 0x231   : > { %1224 = vst.msk [vmem:[#allocation2 + $0x58] sm:$0xff] %vm1212_vm13, %v1207_v53  ;;  %v1308_v14 = vmin.f32 %v1244_v50, %v1292_v45 }
 0x233   : > { %1324 = vst.msk [vmem:[#allocation3 + $0x78] sm:$0xff] %vm1212_vm13, %v1308_v14 }
 0x235   : > { %v1388_v19 = vpop.xlane.xlu0 %1387 }
 0x236   : > { %v1404_v60 = vmin.f32 %v1340_v38, %v1388_v19 }
 0x238   : > { %1420 = vst.msk [vmem:[#allocation4 + $0x78] sm:$0xff] %vm1212_vm13, %v1404_v60  ;;  %v1380_v11 = vpop.xlane.xlu2 %1379 }
 0x239   : > { %v1400_v31 = vmin.f32 %v1336_v5, %v1380_v11 }
 0x23b   : > { %1416 = vst.msk [vmem:[#allocation4 + $0x58] sm:$0xff] %vm1212_vm13, %v1400_v31 }
 0x23f   : > { %1424 = sbr.rel (%p2075_p4) target bundleno = 677 (0x2a5), region = 56 }
 0x240   : > { %v1386_v16 = vpop.xlane.xlu2 %1385 }
 0x241   : > { %v1403_v4 = vmin.f32 %v1339_v62, %v1386_v16 }
 0x243   : > { %1419 = vst.msk [vmem:[#allocation4 + $0x70] sm:$0xff] %vm1212_vm13, %v1403_v4 }
 0x244   : > { %v1425_v10 = vld [vmem:[#allocation2] sm:$0xff]  ;;  %v1426_v49 = vld [vmem:[#allocation2 + $0x8] sm:$0xff]  ;;  %v1427_v8 = vld [vmem:[#allocation2 + $0x10] sm:$0xff] }
 0x245   : > { %v3906_v55 = vld [vmem:[#allocation4] sm:$0xff]  ;;  %v3911_v39 = vld [vmem:[#allocation4 + $0x8] sm:$0xff]  ;;  %v3913_v37 = vld [vmem:[#allocation4 + $0x10] sm:$0xff] }
 0x246   : > { %v3909_v34 = vsub.f32 %v1425_v10, %v3906_v55  ;;  %v3916_v26 = vsub.f32 %v1426_v49, %v3911_v39  ;;  %v3919_v15 = vsub.f32 %v1427_v8, %v3913_v37  ;;  %v1428_v3 = vld [vmem:[#allocation2 + $0x18] sm:$0xff]  ;;  %v1429_v2 = vld [vmem:[#allocation2 + $0x20] sm:$0xff]  ;;  %v1430_v24 = vld [vmem:[#allocation2 + $0x28] sm:$0xff] }
 0x247   : > { %v3921_v17 = vld [vmem:[#allocation4 + $0x18] sm:$0xff]  ;;  %v3935_v22 = vld [vmem:[#allocation4 + $0x20] sm:$0xff]  ;;  %v3941_v13 = vld [vmem:[#allocation4 + $0x28] sm:$0xff] }
 0x248   : > { %v3924_v25 = vsub.f32 0.0, %v3909_v34  ;;  %v3927_v7 = vsub.f32 %v1428_v3, %v3921_v17  ;;  %v3930_v44 = vsub.f32 0.0, %v3916_v26  ;;  %v3933_v30 = vsub.f32 0.0, %v3919_v15  ;;  %v1431_v41 = vld [vmem:[#allocation2 + $0x30] sm:$0xff]  ;;  %v1432_v1 = vld [vmem:[#allocation2 + $0x38] sm:$0xff]  ;;  %v1433_v33 = vld [vmem:[#allocation2 + $0x40] sm:$0xff] }
 0x249   : > { %v3945_v0 = vld [vmem:[#allocation4 + $0x30] sm:$0xff]  ;;  %v3949_v23 = vsub.f32 %v1429_v2, %v3935_v22  ;;  %v3952_v56 = vsub.f32 %v1430_v24, %v3941_v13  ;;  %v3965_v32 = vld [vmem:[#allocation4 + $0x38] sm:$0xff]  ;;  %v3967_v46 = vld [vmem:[#allocation4 + $0x40] sm:$0xff]  ;;  %v1473_v61 = vmax.f32 %v3909_v34, 0.0  ;;  %v1474_v38 = vmax.f32 %v3916_v26, 0.0 }
 0x24a   : > { %v1537_v52 = vand.u32 2147483647, %v3924_v25  ;;  %v3939_v42 = vsub.f32 0.0, %v3927_v7  ;;  %v1538_v36 = vand.u32 2147483647, %v3930_v44  ;;  %v3958_v27 = vsub.f32 %v1431_v41, %v3945_v0  ;;  %v1434_v43 = vld [vmem:[#allocation2 + $0x48] sm:$0xff] }
 0x24b   : > { %v1539_v29 = vand.u32 2147483647, %v3933_v30  ;;  %v3955_v20 = vsub.f32 0.0, %v3949_v23  ;;  %v3961_v12 = vsub.f32 0.0, %v3952_v56  ;;  %v3973_v18 = vld [vmem:[#allocation4 + $0x48] sm:$0xff]  ;;  %v3977_v45 = vsub.f32 %v1432_v1, %v3965_v32  ;;  %v1435_v62 = vld [vmem:[#allocation2 + $0x50] sm:$0xff] }
 0x24c   : > { %v1553_v48 = vsub.f32 0.0, %v1537_v52  ;;  %v1540_v51 = vand.u32 2147483647, %v3939_v42  ;;  %v1554_v47 = vsub.f32 0.0, %v1538_v36  ;;  %v3970_v9 = vsub.f32 0.0, %v3958_v27 }
 0x24d   : > { %v1555_v40 = vsub.f32 0.0, %v1539_v29  ;;  %v1541_v28 = vand.u32 2147483647, %v3955_v20  ;;  %v1542_v6 = vand.u32 2147483647, %v3961_v12  ;;  %v3980_v14 = vsub.f32 %v1433_v33, %v3967_v46 }
 0x24e   : > { %v1569_v35 = vmul.f32 1.442695, %v1553_v48  ;;  %v1556_v57 = vsub.f32 0.0, %v1540_v51  ;;  %v1571_v58 = vmul.f32 1.442695, %v1554_v47  ;;  %v1475_v19 = vmax.f32 %v3919_v15, 0.0 }
 0x24f   : > { %v1573_v21 = vmul.f32 1.442695, %v1555_v40  ;;  %v1557_v54 = vsub.f32 0.0, %v1541_v28  ;;  %v1558_v59 = vsub.f32 0.0, %v1542_v6  ;;  %v1543_v50 = vand.u32 2147483647, %v3970_v9 }
 0x250   : > { %2255 = vpow2.f32 %v1569_v35  ;;  %v1575_v63 = vmul.f32 1.442695, %v1556_v57  ;;  %v1476_v60 = vmax.f32 %v3927_v7, 0.0  ;;  %v1477_v31 = vmax.f32 %v3949_v23, 0.0 }
 0x251   : > { %2257 = vpow2.f32 %v1571_v58  ;;  %v1577_v53 = vmul.f32 1.442695, %v1557_v54  ;;  %v1579_v5 = vmul.f32 1.442695, %v1558_v59  ;;  %v3988_v16 = vsub.f32 %v1434_v43, %v3973_v18 }
 0x252   : > { %2259 = vpow2.f32 %v1573_v21  ;;  %v1559_v8 = vsub.f32 0.0, %v1543_v50  ;;  %v3991_v24 = vsub.f32 0.0, %v3977_v45  ;;  %v3994_v36 = vsub.f32 0.0, %v3980_v14 }
 0x253   : > { %2261 = vpow2.f32 %v1575_v63  ;;  %vm1505_vm14 = vcmp.ne.f32.partialorder %v3924_v25, %v3924_v25  ;;  %vm1506_vm0 = vcmp.ne.f32.partialorder %v3930_v44, %v3930_v44  ;;  %v4001_v21 = vsub.f32 0.0, %v3988_v16 }
 0x254   : > { %2263 = vpow2.f32 %v1577_v53  ;;  %v1581_v58 = vmul.f32 1.442695, %v1559_v8  ;;  %vm1507_vm1 = vcmp.ne.f32.partialorder %v3933_v30, %v3933_v30  ;;  %vm1508_vm10 = vcmp.ne.f32.partialorder %v3939_v42, %v3939_v42 }
 0x255   : > { %2265 = vpow2.f32 %v1579_v5  ;;  %vm1509_vm6 = vcmp.ne.f32.partialorder %v3955_v20, %v3955_v20  ;;  %vm1510_vm5 = vcmp.ne.f32.partialorder %v3961_v12, %v3961_v12  ;;  %v1545_v44 = vand.u32 2147483647, %v3994_v36  ;;  %v4124_v12 = vld [vmem:[#allocation4 + $0x68] sm:$0xff] }
 0x256   : > { %v2256_v11 = vpop.eup %2255  ;;  %v4668_v42 = vmax.f32 %v3952_v56, 0.0  ;;  %v1546_v20 = vand.u32 2147483647, %v4001_v21  ;;  %vm1511_vm11 = vcmp.ne.f32.partialorder %v3970_v9, %v3970_v9  ;;  %vm1512_vm15 = vcmp.ne.f32.partialorder %v3991_v24, %v3991_v24 }
 0x257   : > { %v2258_v4 = vpop.eup %2257  ;;  %v1601_v10 = vadd.f32 1.0, %v2256_v11  ;;  %v1604_v49 = vmul.f32 -0.5, %v2256_v11  ;;  %v1607_v41 = vand.u32 2147483647, %v2256_v11 }
 0x258   : > { %v2260_v3 = vpop.eup %2259  ;;  %v1610_v2 = vadd.f32 1.0, %v2258_v4  ;;  %v1613_v52 = vmul.f32 -0.5, %v2258_v4  ;;  %v1616_v48 = vand.u32 2147483647, %v2258_v4 }
 0x259   : > { %v2262_v29 = vpop.eup %2261  ;;  %2267 = vlog2.f32 %v1601_v10  ;;  %v1619_v51 = vadd.f32 1.0, %v2260_v3  ;;  %v1605_v47 = vadd.f32 1.0, %v1604_v49  ;;  %v1622_v35 = vmul.f32 -0.5, %v2260_v3  ;;  %v4048_v10 = vld [vmem:[#allocation4 + $0x50] sm:$0xff] }
 0x25a   : > { %2269 = vlog2.f32 %v1610_v2  ;;  %v1614_v40 = vadd.f32 1.0, %v1613_v52  ;;  %v1628_v57 = vadd.f32 1.0, %v2262_v29  ;;  %v2264_v63 = vpop.eup %2263  ;;  %v1625_v1 = vand.u32 2147483647, %v2260_v3 }
 0x25b   : > { %2271 = vlog2.f32 %v1619_v51  ;;  %v1623_v28 = vadd.f32 1.0, %v1622_v35  ;;  %v1631_v6 = vmul.f32 -0.5, %v2262_v29  ;;  %v1634_v33 = vand.u32 2147483647, %v2262_v29  ;;  %v2266_v54 = vpop.eup %2265 }
 0x25c   : > { %vm4005_vm3 = vcmp.lt.f32.partialorder %v1607_v41, 0.0004427343  ;;  %2273 = vlog2.f32 %v1628_v57  ;;  %v1637_v43 = vadd.f32 1.0, %v2264_v63  ;;  %v1640_v53 = vmul.f32 -0.5, %v2264_v63 }
 0x25d   : > { %v1606_v50 = vmul.f32 %v2256_v11, %v1605_v47  ;;  %v1615_v5 = vmul.f32 %v2258_v4, %v1614_v40  ;;  %vm4009_vm4 = vcmp.lt.f32.partialorder %v1616_v48, 0.0004427343  ;;  %v1632_v49 = vadd.f32 1.0, %v1631_v6 }
 0x25e   : > { %2275 = vlog2.f32 %v1637_v43  ;;  %v1641_v2 = vadd.f32 1.0, %v1640_v53  ;;  %v1646_v52 = vadd.f32 1.0, %v2266_v54  ;;  %v1649_v41 = vmul.f32 -0.5, %v2266_v54 }
 0x25f   : > { %v2268_v8 = vpop.eup %2267  ;;  %v1624_v57 = vmul.f32 %v2260_v3, %v1623_v28  ;;  %vm4015_vm9 = vcmp.lt.f32.partialorder %v1625_v1, 0.0004427343  ;;  %vm4019_vm12 = vcmp.lt.f32.partialorder %v1634_v33, 0.0004427343  ;;  %v1643_v47 = vand.u32 2147483647, %v2264_v63 }
 0x260   : > { %v2270_v51 = vpop.eup %2269  ;;  %v1603_v35 = vmul.f32 0.6931472, %v2268_v8  ;;  %2277 = vlog2.f32 %v1646_v52  ;;  %v1650_v40 = vadd.f32 1.0, %v1649_v41  ;;  %v1633_v28 = vmul.f32 %v2262_v29, %v1632_v49  ;;  %v1436_v52 = vld [vmem:[#allocation2 + $0x58] sm:$0xff] }
 0x261   : > { %v2272_v4 = vpop.eup %2271  ;;  %v1612_v48 = vmul.f32 0.6931472, %v2270_v51  ;;  %2279 = vpow2.f32 %v1581_v58  ;;  %v1642_v53 = vmul.f32 %v2264_v63, %v1641_v2  ;;  %v1652_v8 = vand.u32 2147483647, %v2266_v54 }
 0x262   : > { %v1609_v6 = vsel %vm4005_vm3, %v1606_v50, %v1603_v35  ;;  %v1621_v3 = vmul.f32 0.6931472, %v2272_v4  ;;  %v2274_v1 = vpop.eup %2273  ;;  %v1544_v58 = vand.u32 2147483647, %v3991_v24  ;;  %vm4044_vm2 = vcmp.lt.f32.partialorder %v1643_v47, 0.0004427343 }
 0x263   : > { %v1745_v33 = vadd.f32 %v1609_v6, %v1473_v61  ;;  %v1618_v43 = vsel %vm4009_vm4, %v1615_v5, %v1612_v48  ;;  %v1630_v50 = vmul.f32 0.6931472, %v2274_v1  ;;  %vm4066_vm7 = vcmp.lt.f32.partialorder %v1652_v8, 0.0004427343  ;;  %v4071_v35 = vld [vmem:[#allocation4 + $0x58] sm:$0xff]  ;;  %v1437_v6 = vld [vmem:[#allocation2 + $0x60] sm:$0xff] }
 0x264   : > { %v1746_v59 = vadd.f32 %v1618_v43, %v1474_v38  ;;  %v1627_v29 = vsel %vm4015_vm9, %v1624_v57, %v1621_v3  ;;  %v2276_v49 = vpop.eup %2275  ;;  %v1651_v38 = vmul.f32 %v2266_v54, %v1650_v40  ;;  %v1560_v2 = vsub.f32 0.0, %v1544_v58  ;;  %v4086_v3 = vld [vmem:[#allocation4 + $0x60] sm:$0xff]  ;;  %v1438_v58 = vld [vmem:[#allocation2 + $0x68] sm:$0xff] }
 0x265   : > { %v1761_v61 = vsel %vm1505_vm14, %v3909_v34, %v1745_v33  ;;  %v1747_v63 = vadd.f32 %v1627_v29, %v1475_v19  ;;  %v1636_v34 = vsel %vm4019_vm12, %v1633_v28, %v1630_v50  ;;  %v1639_v19 = vmul.f32 0.6931472, %v2276_v49 }
 0x266   : > { %1777 = vst.msk [vmem:[%s2572_s0] sm:$0xff] %vm1212_vm13, %v1761_v61  ;;  %v1762_v25 = vsel %vm1506_vm0, %v3916_v26, %v1746_v59  ;;  %v2278_v41 = vpop.eup %2277  ;;  %v1748_v51 = vadd.f32 %v1636_v34, %v1476_v60  ;;  %v4078_v60 = vsub.f32 %v1435_v62, %v4048_v10  ;;  %v1561_v1 = vsub.f32 0.0, %v1545_v44  ;;  %v1439_v34 = vld [vmem:[#allocation2 + $0x70] sm:$0xff] }
 0x267   : > { %1778 = vst.msk [vmem:[%s2572_s0 + $0x8] sm:$0xff] %vm1212_vm13, %v1762_v25  ;;  %v1763_v54 = vsel %vm1507_vm1, %v3919_v15, %v1747_v63  ;;  %v2280_v57 = vpop.eup %2279  ;;  %v1645_v11 = vsel %vm4044_vm2, %v1642_v53, %v1639_v19  ;;  %v1648_v30 = vmul.f32 0.6931472, %v2278_v41  ;;  %v1583_v15 = vmul.f32 1.442695, %v1560_v2  ;;  %v4130_v19 = vld [vmem:[#allocation4 + $0x70] sm:$0xff] }
 0x268   : > { %1779 = vst.msk [vmem:[%s2572_s0 + $0x10] sm:$0xff] %vm1212_vm13, %v1763_v54  ;;  %v1764_v4 = vsel %vm1508_vm10, %v3927_v7, %v1748_v51  ;;  %v1749_v48 = vadd.f32 %v1645_v11, %v1477_v31  ;;  %v1655_v47 = vadd.f32 1.0, %v2280_v57  ;;  %v1658_v40 = vmul.f32 -0.5, %v2280_v57 }
 0x269   : > { %1780 = vst.msk [vmem:[%s2572_s0 + $0x18] sm:$0xff] %vm1212_vm13, %v1764_v4  ;;  %v1654_v28 = vsel %vm4066_vm7, %v1651_v38, %v1648_v30  ;;  %2281 = vpow2.f32 %v1583_v15  ;;  %v4093_v33 = vsub.f32 %v1436_v52, %v4071_v35  ;;  %v1585_v53 = vmul.f32 1.442695, %v1561_v1 }
 0x26a   : > { %v1765_v7 = vsel %vm1509_vm6, %v3949_v23, %v1749_v48  ;;  %v1750_v31 = vadd.f32 %v1654_v28, %v4668_v42  ;;  %2283 = vlog2.f32 %v1655_v47  ;;  %v1659_v43 = vadd.f32 1.0, %v1658_v40 }
 0x26b   : > { %1781 = vst.msk [vmem:[%s2572_s0 + $0x20] sm:$0xff] %vm1212_vm13, %v1765_v7  ;;  %v4104_v8 = vsub.f32 %v1437_v6, %v4086_v3  ;;  %v1661_v29 = vand.u32 2147483647, %v2280_v57  ;;  %v4112_v23 = vsub.f32 0.0, %v4078_v60  ;;  %2285 = vpow2.f32 %v1585_v53 }
 0x26c   : > { %v1766_v59 = vsel %vm1510_vm5, %v3952_v56, %v1750_v31  ;;  %v4117_v50 = vsub.f32 0.0, %v4093_v33  ;;  %v1479_v49 = vmax.f32 %v3958_v27, 0.0  ;;  %v1562_v61 = vsub.f32 0.0, %v1546_v20 }
 0x26d   : > { %1782 = vst.msk [vmem:[%s2572_s0 + $0x28] sm:$0xff] %vm1212_vm13, %v1766_v59  ;;  %v1547_v63 = vand.u32 2147483647, %v4112_v23  ;;  %v4122_v56 = vsub.f32 0.0, %v4104_v8  ;;  %v1660_v38 = vmul.f32 %v2280_v57, %v1659_v43  ;;  %v1480_v62 = vmax.f32 %v3977_v45, 0.0 }
 0x26e   : > { %v1548_v25 = vand.u32 2147483647, %v4117_v50  ;;  %vm4132_vm8 = vcmp.lt.f32.partialorder %v1661_v29, 0.0004427343  ;;  %v1587_v51 = vmul.f32 1.442695, %v1562_v61  ;;  %v4137_v57 = vsub.f32 %v1438_v58, %v4124_v12 }
 0x26f   : > { %v2282_v5 = vpop.eup %2281  ;;  %v1563_v44 = vsub.f32 0.0, %v1547_v63  ;;  %v1549_v15 = vand.u32 2147483647, %v4122_v56  ;;  %v4141_v4 = vsub.f32 %v1439_v34, %v4130_v19  ;;  %v1481_v31 = vmax.f32 %v3980_v14, 0.0  ;;  %v1440_v63 = vld [vmem:[#allocation2 + $0x78] sm:$0xff] }
 0x270   : > { %v2284_v2 = vpop.eup %2283  ;;  %v1664_v41 = vadd.f32 1.0, %v2282_v5  ;;  %v1667_v54 = vmul.f32 -0.5, %v2282_v5  ;;  %v1564_v11 = vsub.f32 0.0, %v1548_v25  ;;  %v1670_v1 = vand.u32 2147483647, %v2282_v5 }
 0x271   : > { %v1657_v26 = vmul.f32 0.6931472, %v2284_v2  ;;  %v2286_v48 = vpop.eup %2285  ;;  %v1589_v40 = vmul.f32 1.442695, %v1563_v44  ;;  %v1482_v43 = vmax.f32 %v3988_v16, 0.0  ;;  %v1565_v53 = vsub.f32 0.0, %v1549_v15 }
 0x272   : > { %2287 = vlog2.f32 %v1664_v41  ;;  %v1668_v30 = vadd.f32 1.0, %v1667_v54  ;;  %v1591_v6 = vmul.f32 1.442695, %v1564_v11  ;;  %v1673_v7 = vadd.f32 1.0, %v2286_v48 }
 0x273   : > { %v1663_v47 = vsel %vm4132_vm8, %v1660_v38, %v1657_v26  ;;  %2289 = vpow2.f32 %v1587_v51  ;;  %v1676_v42 = vmul.f32 -0.5, %v2286_v48  ;;  %v1679_v29 = vand.u32 2147483647, %v2286_v48  ;;  %v4160_v38 = vld [vmem:[#allocation4 + $0x78] sm:$0xff] }
 0x274   : > { %v1751_v28 = vadd.f32 %v1663_v47, %v1479_v49  ;;  %2291 = vpow2.f32 %v1589_v40  ;;  %v4154_v20 = vsub.f32 0.0, %v4137_v57  ;;  %v1669_v58 = vmul.f32 %v2282_v5, %v1668_v30 }
 0x275   : > { %2293 = vlog2.f32 %v1673_v7  ;;  %vm1513_vm14 = vcmp.ne.f32.partialorder %v3994_v36, %v3994_v36  ;;  %v1677_v49 = vadd.f32 1.0, %v1676_v42  ;;  %v1593_v61 = vmul.f32 1.442695, %v1565_v53 }
 0x276   : > { %v1767_v59 = vsel %vm1511_vm11, %v3958_v27, %v1751_v28  ;;  %2295 = vpow2.f32 %v1591_v6  ;;  %vm4162_vm0 = vcmp.lt.f32.partialorder %v1670_v1, 0.0004427343  ;;  %v1483_v9 = vmax.f32 %v4078_v60, 0.0 }
 0x277   : > { %1783 = vst.msk [vmem:[%s2572_s0 + $0x30] sm:$0xff] %vm1212_vm13, %v1767_v59  ;;  %v1550_v34 = vand.u32 2147483647, %v4154_v20  ;;  %v4169_v5 = vsub.f32 0.0, %v4141_v4  ;;  %v1484_v41 = vmax.f32 %v4093_v33, 0.0  ;;  %v1485_v54 = vmax.f32 %v4104_v8, 0.0 }
 0x278   : > { %v2288_v25 = vpop.eup %2287  ;;  %2297 = vpow2.f32 %v1593_v61  ;;  %vm4173_vm1 = vcmp.lt.f32.partialorder %v1679_v29, 0.0004427343  ;;  %v1678_v47 = vmul.f32 %v2286_v48, %v1677_v49  ;;  %v4180_v6 = vsub.f32 %v1440_v63, %v4160_v38 }
 0x279   : > { %v2290_v2 = vpop.eup %2289  ;;  %v1666_v52 = vmul.f32 0.6931472, %v2288_v25  ;;  %v1566_v40 = vsub.f32 0.0, %v1550_v34  ;;  %v1551_v42 = vand.u32 2147483647, %v4169_v5  ;;  %vm1514_vm3 = vcmp.ne.f32.partialorder %v4001_v21, %v4001_v21 }
 0x27a   : > { %v1682_v26 = vadd.f32 1.0, %v2290_v2  ;;  %v1685_v44 = vmul.f32 -0.5, %v2290_v2  ;;  %v1688_v11 = vand.u32 2147483647, %v2290_v2  ;;  %v2292_v30 = vpop.eup %2291  ;;  %vm1515_vm9 = vcmp.ne.f32.partialorder %v4112_v23, %v4112_v23 }
 0x27b   : > { %v1672_v15 = vsel %vm4162_vm0, %v1669_v58, %v1666_v52  ;;  %v2294_v28 = vpop.eup %2293  ;;  %v1691_v29 = vadd.f32 1.0, %v2292_v30  ;;  %v1694_v48 = vmul.f32 -0.5, %v2292_v30  ;;  %v1697_v58 = vand.u32 2147483647, %v2292_v30 }
 0x27c   : > { %v1752_v1 = vadd.f32 %v1672_v15, %v1480_v62  ;;  %2299 = vlog2.f32 %v1682_v26  ;;  %v1686_v7 = vadd.f32 1.0, %v1685_v44  ;;  %v2296_v53 = vpop.eup %2295  ;;  %v1675_v59 = vmul.f32 0.6931472, %v2294_v28 }
 0x27d   : > { %vm4191_vm4 = vcmp.lt.f32.partialorder %v1688_v11, 0.0004427343  ;;  %v1700_v62 = vadd.f32 1.0, %v2296_v53  ;;  %v1703_v63 = vmul.f32 -0.5, %v2296_v53  ;;  %2301 = vlog2.f32 %v1691_v29 }
 0x27e   : > { %v1768_v49 = vsel %vm1512_vm15, %v3977_v45, %v1752_v1  ;;  %v2298_v25 = vpop.eup %2297  ;;  %v1681_v27 = vsel %vm4173_vm1, %v1678_v47, %v1675_v59  ;;  %v1695_v34 = vadd.f32 1.0, %v1694_v48  ;;  %vm4199_vm10 = vcmp.lt.f32.partialorder %v1697_v58, 0.0004427343  ;;  %v1793_v47 = vld [vmem:[#allocation3] sm:$0xff]  ;;  %v1794_v48 = vld [vmem:[#allocation3 + $0x8] sm:$0xff] }
 0x27f   : > { %1784 = vst.msk [vmem:[%s2572_s0 + $0x38] sm:$0xff] %vm1212_vm13, %v1768_v49  ;;  %v1753_v24 = vadd.f32 %v1681_v27, %v1481_v31  ;;  %2303 = vlog2.f32 %v1700_v62  ;;  %v1704_v45 = vadd.f32 1.0, %v1703_v63  ;;  %v1706_v26 = vand.u32 2147483647, %v2296_v53 }
 0x280   : > { %v1687_v44 = vmul.f32 %v2290_v2, %v1686_v7  ;;  %vm1516_vm12 = vcmp.ne.f32.partialorder %v4117_v50, %v4117_v50  ;;  %v1709_v51 = vadd.f32 1.0, %v2298_v25  ;;  %v1712_v11 = vmul.f32 -0.5, %v2298_v25 }
 0x281   : > { %v1715_v15 = vand.u32 2147483647, %v2298_v25  ;;  %v1769_v31 = vsel %vm1513_vm14, %v3980_v14, %v1753_v24  ;;  %v1696_v1 = vmul.f32 %v2292_v30, %v1695_v34  ;;  %v1705_v59 = vmul.f32 %v2296_v53, %v1704_v45  ;;  %v1795_v53 = vld [vmem:[#allocation3 + $0x10] sm:$0xff]  ;;  %v1796_v24 = vld [vmem:[#allocation3 + $0x18] sm:$0xff]  ;;  %v1797_v45 = vld [vmem:[#allocation3 + $0x20] sm:$0xff] }
 0x282   : > { %v2300_v28 = vpop.eup %2299  ;;  %v1595_v29 = vmul.f32 1.442695, %v1566_v40  ;;  %1785 = vst.msk [vmem:[%s2572_s0 + $0x40] sm:$0xff] %vm1212_vm13, %v1769_v31  ;;  %vm4213_vm6 = vcmp.lt.f32.partialorder %v1706_v26, 0.0004427343  ;;  %2305 = vlog2.f32 %v1709_v51  ;;  %v1713_v58 = vadd.f32 1.0, %v1712_v11 }
 0x283   : > { %v1684_v2 = vmul.f32 0.6931472, %v2300_v28  ;;  %vm1517_vm5 = vcmp.ne.f32.partialorder %v4122_v56, %v4122_v56  ;;  %v1567_v49 = vsub.f32 0.0, %v1551_v42  ;;  %v4220_v14 = vsub.f32 0.0, %v4180_v6  ;;  %v2302_v36 = vpop.eup %2301  ;;  %v1803_v40 = vld [vmem:[#allocation3 + $0x50] sm:$0xff]  ;;  %v1804_v56 = vld [vmem:[#allocation3 + $0x58] sm:$0xff] }
 0x284   : > { %2307 = vpow2.f32 %v1595_v29  ;;  %vm1825_vm2 = vcmp.lt.f32.partialorder %v1793_v47, %v3906_v55  ;;  %vm4225_vm7 = vcmp.lt.f32.partialorder %v1715_v15, 0.0004427343  ;;  %vm1826_vm11 = vcmp.lt.f32.partialorder %v1794_v48, %v3911_v39 }
 0x285   : > { %v1690_v30 = vsel %vm4191_vm4, %v1687_v44, %v1684_v2  ;;  %v2304_v62 = vpop.eup %2303  ;;  %v1693_v63 = vmul.f32 0.6931472, %v2302_v36  ;;  %v1714_v27 = vmul.f32 %v2298_v25, %v1713_v58  ;;  %v1597_v34 = vmul.f32 1.442695, %v1567_v49  ;;  %v1800_v58 = vld [vmem:[#allocation3 + $0x38] sm:$0xff] }
 0x286   : > { %v1754_v42 = vadd.f32 %v1690_v30, %v1482_v43  ;;  %v1702_v61 = vmul.f32 0.6931472, %v2304_v62  ;;  %v1552_v26 = vand.u32 2147483647, %v4220_v14  ;;  %v2421_v44 = vmov 0.0  }
 0x287   : > { %v2076_v39 = vsel %vm1825_vm2, 1.0, %v2421_v44  ;;  %v2077_v51 = vsel %vm1826_vm11, 1.0, %v2421_v44  ;;  %v1699_v25 = vsel %vm4199_vm10, %v1696_v1, %v1693_v63  ;;  %2309 = vpow2.f32 %v1597_v34  ;;  %v1806_v63 = vld [vmem:[#allocation3 + $0x68] sm:$0xff] }
 0x288   : > { %v1770_v43 = vsel %vm1514_vm3, %v3988_v16, %v1754_v42  ;;  %1873 = vst.msk [vmem:[%s2581_s1] sm:$0xff] %vm1212_vm13, %v2076_v39  ;;  %vm1827_vm8 = vcmp.lt.f32.partialorder %v1795_v53, %v3913_v37  ;;  %v2306_v11 = vpop.eup %2305  ;;  %v1755_v55 = vadd.f32 %v1699_v25, %v1483_v9  ;;  %v1708_v15 = vsel %vm4213_vm6, %v1705_v59, %v1702_v61  ;;  %v1798_v37 = vld [vmem:[#allocation3 + $0x28] sm:$0xff]  ;;  %v1805_v42 = vld [vmem:[#allocation3 + $0x60] sm:$0xff] }
 0x289   : > { %1786 = vst.msk [vmem:[%s2572_s0 + $0x48] sm:$0xff] %vm1212_vm13, %v1770_v43  ;;  %v1568_v16 = vsub.f32 0.0, %v1552_v26  ;;  %v2078_v21 = vsel %vm1827_vm8, 1.0, %v2421_v44  ;;  %v1756_v47 = vadd.f32 %v1708_v15, %v1484_v41  ;;  %v1711_v28 = vmul.f32 0.6931472, %v2306_v11  ;;  %v1799_v41 = vld [vmem:[#allocation3 + $0x30] sm:$0xff] }
 0x28a   : > { %v2308_v52 = vpop.eup %2307  ;;  %1874 = vst.msk [vmem:[%s2581_s1 + $0x8] sm:$0xff] %vm1212_vm13, %v2077_v51  ;;  %vm1828_vm15 = vcmp.lt.f32.partialorder %v1796_v24, %v3921_v17  ;;  %vm1829_vm14 = vcmp.lt.f32.partialorder %v1797_v45, %v3935_v22  ;;  %v1771_v9 = vsel %vm1515_vm9, %v4078_v60, %v1755_v55  ;;  %v1486_v2 = vmax.f32 %v4137_v57, 0.0  ;;  %v1802_v22 = vld [vmem:[#allocation3 + $0x48] sm:$0xff]  ;;  %v1808_v26 = vld [vmem:[#allocation3 + $0x78] sm:$0xff] }
 0x28b   : > { %v1718_v31 = vadd.f32 1.0, %v2308_v52  ;;  %v1721_v1 = vmul.f32 -0.5, %v2308_v52  ;;  %v1724_v59 = vand.u32 2147483647, %v2308_v52  ;;  %1875 = vst.msk [vmem:[%s2581_s1 + $0x10] sm:$0xff] %vm1212_vm13, %v2078_v21  ;;  %v1772_v17 = vsel %vm1516_vm12, %v4093_v33, %v1756_v47 }
 0x28c   : > { %1787 = vst.msk [vmem:[%s2572_s0 + $0x50] sm:$0xff] %vm1212_vm13, %v1771_v9  ;;  %v1717_v29 = vsel %vm4225_vm7, %v1714_v27, %v1711_v28  ;;  %v1599_v48 = vmul.f32 1.442695, %v1568_v16  ;;  %v2079_v60 = vsel %vm1828_vm15, 1.0, %v2421_v44  ;;  %v2080_v33 = vsel %vm1829_vm14, 1.0, %v2421_v44 }
 0x28d   : > { %1788 = vst.msk [vmem:[%s2572_s0 + $0x58] sm:$0xff] %vm1212_vm13, %v1772_v17  ;;  %v1757_v23 = vadd.f32 %v1717_v29, %v1485_v54  ;;  %2311 = vlog2.f32 %v1718_v31  ;;  %v1722_v7 = vadd.f32 1.0, %v1721_v1  ;;  %v2310_v50 = vpop.eup %2309  ;;  %vm1830_vm0 = vcmp.lt.f32.partialorder %v1798_v37, %v3941_v13  ;;  %v1801_v54 = vld [vmem:[#allocation3 + $0x40] sm:$0xff] }
 0x28e   : > { %2313 = vpow2.f32 %v1599_v48  ;;  %1876 = vst.msk [vmem:[%s2581_s1 + $0x18] sm:$0xff] %vm1212_vm13, %v2079_v60  ;;  %vm1831_vm1 = vcmp.lt.f32.partialorder %v1799_v41, %v3945_v0  ;;  %vm1518_vm3 = vcmp.ne.f32.partialorder %v4154_v20, %v4154_v20  ;;  %v1727_v36 = vadd.f32 1.0, %v2310_v50 }
 0x28f   : > { %v1773_v49 = vsel %vm1517_vm5, %v4104_v8, %v1757_v23  ;;  %v1730_v30 = vmul.f32 -0.5, %v2310_v50  ;;  %1877 = vst.msk [vmem:[%s2581_s1 + $0x20] sm:$0xff] %vm1212_vm13, %v2080_v33  ;;  %vm4296_vm4 = vcmp.lt.f32.partialorder %v1724_v59, 0.0004427343  ;;  %v2081_v0 = vsel %vm1830_vm0, 1.0, %v2421_v44 }
 0x290   : > { %1789 = vst.msk [vmem:[%s2572_s0 + $0x60] sm:$0xff] %vm1212_vm13, %v1773_v49  ;;  %v2082_v8 = vsel %vm1831_vm1, 1.0, %v2421_v44  ;;  %vm1832_vm10 = vcmp.lt.f32.partialorder %v1800_v58, %v3965_v32  ;;  %2315 = vlog2.f32 %v1727_v36  ;;  %vm1833_vm9 = vcmp.lt.f32.partialorder %v1801_v54, %v3967_v46  ;;  %v1807_v32 = vld [vmem:[#allocation3 + $0x70] sm:$0xff] }
 0x291   : > { %v1731_v53 = vadd.f32 1.0, %v1730_v30  ;;  %1878 = vst.msk [vmem:[%s2581_s1 + $0x28] sm:$0xff] %vm1212_vm13, %v2081_v0  ;;  %v2083_v62 = vsel %vm1832_vm10, 1.0, %v2421_v44  ;;  %v1723_v27 = vmul.f32 %v2308_v52, %v1722_v7  ;;  %v2084_v34 = vsel %vm1833_vm9, 1.0, %v2421_v44 }
 0x292   : > { %1879 = vst.msk [vmem:[%s2581_s1 + $0x30] sm:$0xff] %vm1212_vm13, %v2082_v8  ;;  %vm1834_vm12 = vcmp.lt.f32.partialorder %v1802_v22, %v3973_v18  ;;  %vm1835_vm6 = vcmp.lt.f32.partialorder %v1803_v40, %v4048_v10  ;;  %v1733_v45 = vand.u32 2147483647, %v2310_v50  ;;  %vm1836_vm5 = vcmp.lt.f32.partialorder %v1804_v56, %v4071_v35 }
 0x293   : > { %v2312_v24 = vpop.eup %2311  ;;  %1880 = vst.msk [vmem:[%s2581_s1 + $0x38] sm:$0xff] %vm1212_vm13, %v2083_v62  ;;  %v2085_v46 = vsel %vm1834_vm12, 1.0, %v2421_v44  ;;  %v2086_v61 = vsel %vm1835_vm6, 1.0, %v2421_v44  ;;  %v2087_v18 = vsel %vm1836_vm5, 1.0, %v2421_v44  ;;  %vm1837_vm2 = vcmp.lt.f32.partialorder %v1805_v42, %v4086_v3 }
 0x294   : > { %v2314_v39 = vpop.eup %2313  ;;  %v1720_v51 = vmul.f32 0.6931472, %v2312_v24  ;;  %1881 = vst.msk [vmem:[%s2581_s1 + $0x40] sm:$0xff] %vm1212_vm13, %v2084_v34  ;;  %vm1838_vm7 = vcmp.lt.f32.partialorder %v1806_v63, %v4124_v12  ;;  %v1732_v10 = vmul.f32 %v2310_v50, %v1731_v53  ;;  %v2088_v35 = vsel %vm1837_vm2, 1.0, %v2421_v44 }
 0x295   : > { %v1736_v43 = vadd.f32 1.0, %v2314_v39  ;;  %v1739_v25 = vmul.f32 -0.5, %v2314_v39  ;;  %1882 = vst.msk [vmem:[%s2581_s1 + $0x48] sm:$0xff] %vm1212_vm13, %v2085_v46  ;;  %v2089_v55 = vsel %vm1838_vm7, 1.0, %v2421_v44  ;;  %vm1839_vm11 = vcmp.lt.f32.partialorder %v1807_v32, %v4130_v19 }
 0x296   : > { %v1726_v11 = vsel %vm4296_vm4, %v1723_v27, %v1720_v51  ;;  %1883 = vst.msk [vmem:[%s2581_s1 + $0x50] sm:$0xff] %vm1212_vm13, %v2086_v61  ;;  %vm1840_vm8 = vcmp.lt.f32.partialorder %v1808_v26, %v4160_v38  ;;  %v2316_v3 = vpop.eup %2315  ;;  %v1487_v15 = vmax.f32 %v4141_v4, 0.0  ;;  %vm1734_vm15 = vcmp.lt.f32.partialorder %v1733_v45, 0.0004427343 }
 0x297   : > { %v1758_v12 = vadd.f32 %v1726_v11, %v1486_v2  ;;  %2317 = vlog2.f32 %v1736_v43  ;;  %1884 = vst.msk [vmem:[%s2581_s1 + $0x58] sm:$0xff] %vm1212_vm13, %v2087_v18  ;;  %v1729_v16 = vmul.f32 0.6931472, %v2316_v3  ;;  %v1740_v21 = vadd.f32 1.0, %v1739_v25 }
 0x298   : > { %1885 = vst.msk [vmem:[%s2581_s1 + $0x60] sm:$0xff] %vm1212_vm13, %v2088_v35  ;;  %v2090_v52 = vsel %vm1839_vm11, 1.0, %v2421_v44  ;;  %v1742_v38 = vand.u32 2147483647, %v2314_v39  ;;  %v2091_v47 = vsel %vm1840_vm8, 1.0, %v2421_v44  ;;  %vm1519_vm14 = vcmp.ne.f32.partialorder %v4169_v5, %v4169_v5 }
 0x299   : > { %v1774_v19 = vsel %vm1518_vm3, %v4137_v57, %v1758_v12  ;;  %1886 = vst.msk [vmem:[%s2581_s1 + $0x68] sm:$0xff] %vm1212_vm13, %v2089_v55  ;;  %v1735_v28 = vsel %vm1734_vm15, %v1732_v10, %v1729_v16  ;;  %v1741_v9 = vmul.f32 %v2314_v39, %v1740_v21  ;;  %v1488_v31 = vmax.f32 %v4180_v6, 0.0 }
 0x29a   : > { %1790 = vst.msk [vmem:[%s2572_s0 + $0x68] sm:$0xff] %vm1212_vm13, %v1774_v19  ;;  %v1759_v37 = vadd.f32 %v1735_v28, %v1487_v15  ;;  %vm1743_vm0 = vcmp.lt.f32.partialorder %v1742_v38, 0.0004427343  ;;  %vm1520_vm1 = vcmp.ne.f32.partialorder %v4220_v14, %v4220_v14 }
 0x29b   : > { %1887 = vst.msk [vmem:[%s2581_s1 + $0x70] sm:$0xff] %vm1212_vm13, %v2090_v52 }
 0x29c   : > { %1888 = vst.msk [vmem:[%s2581_s1 + $0x78] sm:$0xff] %vm1212_vm13, %v2091_v47  ;;  %v1775_v57 = vsel %vm1519_vm14, %v4141_v4, %v1759_v37 }
 0x29d   : > { %v2318_v20 = vpop.eup %2317  ;;  %1791 = vst.msk [vmem:[%s2572_s0 + $0x70] sm:$0xff] %vm1212_vm13, %v1775_v57 }
 0x29e   : > { %v1738_v44 = vmul.f32 0.6931472, %v2318_v20 }
 0x2a0   : > { %v1744_v5 = vsel %vm1743_vm0, %v1741_v9, %v1738_v44 }
 0x2a1   : > { %v1760_v1 = vadd.f32 %v1744_v5, %v1488_v31 }
 0x2a3   : > { %v1776_v59 = vsel %vm1520_vm1, %v4180_v6, %v1760_v1 }
 0x2a4   : > { %1792 = vst.msk [vmem:[%s2572_s0 + $0x78] sm:$0xff] %vm1212_vm13, %v1776_v59 }
 0x2a5 PF: > { %s21_s8 = sadd.s32 1, %s2415_s8   ;;  %s4685_s1 = sld [smem:[#allocation8_spill]] }
 0x2a6   : > { %p18_p5 = scmp.ge.s32.totalorder %s21_s8, 6   ;;  %s4686_s11 = sld [smem:[#allocation9_spill]] }
 0x2a7   : > { %s4687_s24 = smov %s2391_s25  ;;  %s4688_s25 = smov %s2395_s26 }
 0x2a8   : > { %s4689_s26 = smov %s2520_s15  ;;  %s4690_s27 = smov %s2407_s29 }
 0x2a9   : > { %s4691_s28 = smov %s2411_s30  ;;  %20 = sbr.rel (!%p18_p5) target bundleno = 9 (0x9), region = 119 }
 0x2ab   : > { %s4692_s29 = smov %s4685_s1 }
 0x2ac   : > { %s4693_s30 = smov %s4686_s11 }
 0x2ae   :  { %1928 = vsyncpa [#allocation6], 1 }
 0x2af   :  { %1930 = vsyncpa [#allocation6 + $0x1], 1 }

</bundles_post_ra>
